<compile_context>
chip_gen: v5e
topology: v5e:2x2
jax: 0.10.0
libtpu: 0.0.40
codegen_flags: <defaults>
</compile_context>

<pallas_src>
import functools

import jax
import jax.numpy as jnp
from jax.experimental import pallas as pl
from jax.experimental.pallas import tpu as pltpu


def _triplet_kernel(a_ref, p_ref, n_ref, out_ref, *, margin, p_norm, eps, pack, feat):
    # Load in native dtype, upcast in-register (HBM traffic stays narrow).
    a = a_ref[...].astype(jnp.float32)                    # (T, pack*feat)
    d_pos = a - p_ref[...].astype(jnp.float32) + eps      # eps on the diff (torch pairwise_distance)
    d_neg = a - n_ref[...].astype(jnp.float32) + eps

    def elem_pow(x):
        if p_norm == 1:
            return jnp.abs(x)
        if p_norm == 2:
            return x * x
        p_int = int(p_norm) if float(p_norm) == int(p_norm) else None
        m = jnp.abs(x)
        if p_int is not None and 2 < p_int <= 8:
            # small integer p: repeated VPU multiplies, no EUP power over the block
            acc = m
            for _ in range(p_int - 1):
                acc = acc * m
            return acc
        # TODO(synk): non-integer / large p falls back to jnp.power over the full
        # block (EUP-bound); not exercised by the module's default p=2.
        return jnp.power(m, float(p_norm))

    t = a.shape[0]
    # Segmented lane reduction: each lane-row holds `pack` original rows.
    pos = jnp.sum(elem_pow(d_pos).reshape(t, pack, feat), axis=-1)   # (T, pack)
    neg = jnp.sum(elem_pow(d_neg).reshape(t, pack, feat), axis=-1)

    def root(s):
        if p_norm == 1:
            return s
        if p_norm == 2:
            return jnp.sqrt(s)
        return jnp.power(s, 1.0 / float(p_norm))

    loss = jnp.maximum(root(pos) - root(neg) + margin, 0.0)          # (T, pack)
    # Lane-major slab store: one dense store per block instead of T/8 masked
    # single-lane stores.  Row-major flatten == original row order.
    out_ref[...] = loss.reshape(out_ref.shape)


def _pick_pack_factor(n_rows, n_feat, *, max_pack=8):
    """Rows packed per lane-row via a free wrapper reshape (lane density for D<128)."""
    if n_feat % 128 == 0:
        return 1
    for r in range(2, max_pack + 1):                     # smallest perfectly lane-dense factor
        if n_rows % r == 0 and (r * n_feat) % 128 == 0:
            return r
    r = max(1, 128 // n_feat)                            # partial-fill fallback
    while r > 1 and n_rows % r:
        r -= 1
    return r


def _pick_tile_rows(n_rows, row_bytes, sublane_mult, *, target_bytes=1 << 20, min_grid_steps=4):
    """Packed rows per input block.

    ~1 MiB per input block (3 inputs x 2 pipeline buffers ~= 6 MiB: safe under
    v5e's 16 MiB default scoped VMEM and within v7x's 64 MiB physical per-TC
    VMEM), capped so the grid has >= min_grid_steps steps (DMA/compute overlap
    and megacore / v7x dual-TC occupancy).
    """
    if n_rows <= sublane_mult:
        return n_rows                                    # full-dim block is always legal

    def down(x):
        return max(sublane_mult, (x // sublane_mult) * sublane_mult)

    t_bytes = down(target_bytes // max(row_bytes, 1))
    t_occ = down(pl.cdiv(n_rows, min_grid_steps))
    return int(min(down(n_rows), t_bytes, t_occ))


def triplet_loss(anchor, positive, negative, *, margin=1.0, p=2, eps=1e-6,
                 reduction="mean", tile_rows=None):
    """TripletLoss forward; distances + hinge computed in a Pallas TPU kernel."""
    assert anchor.shape == positive.shape == negative.shape
    assert anchor.ndim == 2, "expected [batch, features] embeddings"
    if reduction not in ("mean", "sum", "none"):
        raise ValueError(f"Unknown reduction: {reduction}")

    dtype = jnp.result_type(anchor.dtype, positive.dtype, negative.dtype)
    if not jnp.issubdtype(dtype, jnp.floating):
        dtype = jnp.float32
    # Inputs stream in their native (possibly bf16/fp16) dtype; no wrapper upcast.
    anchor, positive, negative = (x.astype(dtype) for x in (anchor, positive, negative))

    B, D = anchor.shape
    itemsize = jnp.dtype(dtype).itemsize
    sublane_mult = {1: 32, 2: 16}.get(itemsize, 8)       # min sublane tile per dtype

    pack = _pick_pack_factor(B, D)
    rows_packed, cols = B // pack, pack * D
    # Free row-major reshape: packs `pack` embedding rows into each lane-row.
    a2, p2, n2 = (x.reshape(rows_packed, cols) for x in (anchor, positive, negative))

    if tile_rows is not None:
        t = max(1, min(int(tile_rows), rows_packed))
    else:
        t = _pick_tile_rows(rows_packed, cols * itemsize, sublane_mult)
    num_blocks = pl.cdiv(rows_packed, t)
    rows_per_block = t * pack

    kernel = functools.partial(_triplet_kernel, margin=float(margin), p_norm=p,
                               eps=float(eps), pack=pack, feat=D)

    in_spec = pl.BlockSpec((t, cols), lambda i: (i, 0))
    # Out block's last two dims equal the full array dims -> always layout-legal
    # and written as one lane-dense slab per grid step.
    out_spec = pl.BlockSpec((1, 1, rows_per_block), lambda i: (i, 0, 0))

    cost = pl.CostEstimate(
        flops=8 * B * D,
        transcendentals=2 * B if p == 2 else 0,
        bytes_accessed=3 * B * D * itemsize + B * 4)

    slab = pl.pallas_call(
        kernel,
        out_shape=jax.ShapeDtypeStruct((num_blocks, 1, rows_per_block), jnp.float32),
        grid_spec=pltpu.PrefetchScalarGridSpec(
            num_scalar_prefetch=0,
            grid=(num_blocks,),
            in_specs=[in_spec, in_spec, in_spec],
            out_specs=out_spec,
        ),
        compiler_params=pltpu.CompilerParams(
            dimension_semantics=("parallel",),   # rows independent -> megacore / v7x 2-TC friendly
        ),
        cost_estimate=cost,
    )(a2, p2, n2)

    # Ragged padding rows (garbage values from the overhanging final block) are
    # dropped here, before any reduction, so they can never contaminate mean/sum.
    per_row = slab.reshape(-1)[:B]
    if reduction == "mean":
        return jnp.mean(per_row)
    if reduction == "sum":
        return jnp.sum(per_row)
    return per_row


def _reference_triplet_loss(anchor, positive, negative, margin=1.0, p=2,
                            eps=1e-6, reduction="mean"):
    """Plain-JAX reference mirroring the PyTorch forward (computed in f32)."""
    def pdist(x, y):
        d = x.astype(jnp.float32) - y.astype(jnp.float32) + eps
        return jnp.sum(jnp.abs(d) ** p, axis=-1) ** (1.0 / p)

    loss = jnp.maximum(pdist(anchor, positive) - pdist(anchor, negative) + margin, 0.0)
    if reduction == "mean":
        return jnp.mean(loss)
    if reduction == "sum":
        return jnp.sum(loss)
    return loss


if __name__ == "__main__":
    key = jax.random.PRNGKey(0)
    k1, k2, k3, k4, k5 = jax.random.split(key, 5)

    # f32 embeddings, D=64 (packs 2 rows per lane-row), multi-block grid, mean.
    B, D = 256, 64
    anchor = jax.random.normal(k1, (B, D), dtype=jnp.float32)
    positive = anchor + 0.1 * jax.random.normal(k2, (B, D), dtype=jnp.float32)
    negative = jax.random.normal(k3, (B, D), dtype=jnp.float32)

    out = jax.block_until_ready(triplet_loss(anchor, positive, negative))
    ref = _reference_triplet_loss(anchor, positive, negative)
    assert jnp.allclose(out, ref, rtol=1e-5, atol=1e-5), (out, ref)

    # Ragged row count + D=48 (packs 8 rows per lane-row) + p=1 + 'none'.
    B2, D2 = 200, 48
    a2 = jax.random.normal(k4, (B2, D2), dtype=jnp.float32)
    p2 = a2 + 0.2 * jax.random.normal(k5, (B2, D2), dtype=jnp.float32)
    n2 = jax.random.normal(k1, (B2, D2), dtype=jnp.float32)

    out2 = jax.block_until_ready(
        triplet_loss(a2, p2, n2, margin=0.5, p=1, reduction="none"))
    ref2 = _reference_triplet_loss(a2, p2, n2, margin=0.5, p=1, reduction="none")
    assert out2.shape == (B2,)
    assert jnp.allclose(out2, ref2, rtol=1e-5, atol=1e-5)

    # bf16 embeddings streamed in native dtype + sum reduction.
    B3, D3 = 192, 64
    a3 = jax.random.normal(k2, (B3, D3), dtype=jnp.bfloat16)
    p3 = (a3.astype(jnp.float32)
          + 0.1 * jax.random.normal(k3, (B3, D3), dtype=jnp.float32)).astype(jnp.bfloat16)
    n3 = jax.random.normal(k5, (B3, D3), dtype=jnp.bfloat16)

    out3 = jax.block_until_ready(triplet_loss(a3, p3, n3, reduction="sum"))
    ref3 = _reference_triplet_loss(a3, p3, n3, reduction="sum")
    assert jnp.allclose(out3, ref3, rtol=1e-4, atol=1e-4), (out3, ref3)

    print("KERNEL_OK")
</pallas_src>

<mosaic_0001>
module attributes {stable_mosaic.version = 11 : i64} {
  func.func @_triplet_kernel(%arg0: i32, %arg1: memref<32x128xf32, #tpu.memory_space<vmem>>, %arg2: memref<32x128xf32, #tpu.memory_space<vmem>>, %arg3: memref<32x128xf32, #tpu.memory_space<vmem>>, %arg4: memref<1x1x64xf32, #tpu.memory_space<vmem>>) attributes {dimension_semantics = [#tpu.dimension_semantics<parallel>], iteration_bounds = array<i64: 4>, scalar_prefetch = 0 : i64, scratch_operands = 0 : i64, tpu.core_type = #tpu.core_type<tc>, window_params = [{transform_indices = @transform_0, window_bounds = array<i64: 32, 128>}, {transform_indices = @transform_1, window_bounds = array<i64: 32, 128>}, {transform_indices = @transform_2, window_bounds = array<i64: 32, 128>}, {transform_indices = @transform_3, window_bounds = array<i64: 1, 1, 64>}]} {
    %c0 = arith.constant 0 : index
    %c0_0 = arith.constant 0 : index
    %0 = vector.load %arg1[%c0, %c0_0] : memref<32x128xf32, #tpu.memory_space<vmem>>, vector<32x128xf32>
    %c0_1 = arith.constant 0 : index
    %c0_2 = arith.constant 0 : index
    %1 = vector.load %arg2[%c0_1, %c0_2] : memref<32x128xf32, #tpu.memory_space<vmem>>, vector<32x128xf32>
    %2 = arith.subf %0, %1 : vector<32x128xf32>
    %cst = arith.constant 9.99999997E-7 : f32
    %3 = vector.broadcast %cst : f32 to vector<32x128xf32>
    %4 = arith.addf %2, %3 : vector<32x128xf32>
    %c0_3 = arith.constant 0 : index
    %c0_4 = arith.constant 0 : index
    %5 = vector.load %arg3[%c0_3, %c0_4] : memref<32x128xf32, #tpu.memory_space<vmem>>, vector<32x128xf32>
    %6 = arith.subf %0, %5 : vector<32x128xf32>
    %cst_5 = arith.constant 9.99999997E-7 : f32
    %7 = vector.broadcast %cst_5 : f32 to vector<32x128xf32>
    %8 = arith.addf %6, %7 : vector<32x128xf32>
    %9 = arith.mulf %4, %4 : vector<32x128xf32>
    %10 = vector.shape_cast %9 : vector<32x128xf32> to vector<32x2x64xf32>
    %cst_6 = arith.constant dense<0.000000e+00> : vector<32x2xf32>
    %11 = vector.multi_reduction <add>, %10, %cst_6 [2] : vector<32x2x64xf32> to vector<32x2xf32>
    %12 = arith.mulf %8, %8 : vector<32x128xf32>
    %13 = vector.shape_cast %12 : vector<32x128xf32> to vector<32x2x64xf32>
    %cst_7 = arith.constant dense<0.000000e+00> : vector<32x2xf32>
    %14 = vector.multi_reduction <add>, %13, %cst_7 [2] : vector<32x2x64xf32> to vector<32x2xf32>
    %15 = math.sqrt %11 : vector<32x2xf32>
    %16 = math.sqrt %14 : vector<32x2xf32>
    %17 = arith.subf %15, %16 : vector<32x2xf32>
    %cst_8 = arith.constant 1.000000e+00 : f32
    %18 = vector.broadcast %cst_8 : f32 to vector<32x2xf32>
    %19 = arith.addf %17, %18 : vector<32x2xf32>
    %cst_9 = arith.constant 0.000000e+00 : f32
    %20 = vector.broadcast %cst_9 : f32 to vector<32x2xf32>
    %21 = arith.maximumf %19, %20 : vector<32x2xf32>
    %22 = vector.shape_cast %21 : vector<32x2xf32> to vector<1x1x64xf32>
    %c0_10 = arith.constant 0 : index
    %c0_11 = arith.constant 0 : index
    %c0_12 = arith.constant 0 : index
    %23 = vector.load %arg4[%c0_10, %c0_11, %c0_12] : memref<1x1x64xf32, #tpu.memory_space<vmem>>, vector<1x1x64xf32>
    tpu.vector_store %arg4[%c0_10, %c0_11, %c0_12], %22 {strides = array<i32>} : memref<1x1x64xf32, #tpu.memory_space<vmem>>, vector<1x1x64xf32>,
    return
  }
  func.func @transform_0(%arg0: i32) -> (i32, i32) {
    %c0_i32 = arith.constant 0 : i32
    %c0_i32_0 = arith.constant 0 : i32
    return %arg0, %c0_i32 : i32, i32
  }
  func.func @transform_1(%arg0: i32) -> (i32, i32) {
    %c0_i32 = arith.constant 0 : i32
    %c0_i32_0 = arith.constant 0 : i32
    return %arg0, %c0_i32 : i32, i32
  }
  func.func @transform_2(%arg0: i32) -> (i32, i32) {
    %c0_i32 = arith.constant 0 : i32
    %c0_i32_0 = arith.constant 0 : i32
    return %arg0, %c0_i32 : i32, i32
  }
  func.func @transform_3(%arg0: i32) -> (i32, i32, i32) {
    %c0_i32 = arith.constant 0 : i32
    %c0_i32_0 = arith.constant 0 : i32
    %c0_i32_1 = arith.constant 0 : i32
    return %arg0, %c0_i32, %c0_i32_0 : i32, i32, i32
  }
}

</mosaic_0001>

<bundles_post_ra>
// kernel: tpu_custom_call.1
= control target key start
LH: loop header
LB: loop body
LE: loop exit
PB: predicated region body
PF: predicated region fallthrough
CT: control target
= control target key end

     0   :  { %s4186_s0 = inlined_call_operand.hbm [shape: f32[128,128], index: 0, kind: input, shape index: {}]   ;;  %s4187_s1 = inlined_call_operand.hbm [shape: f32[128,128], index: 1, kind: input, shape index: {}]   ;;  %s4188_s2 = inlined_call_operand.hbm [shape: f32[128,128], index: 2, kind: input, shape index: {}]   ;;  %s4189_s3 = inlined_call_operand.hbm [shape: f32[4,1,64], index: 3, kind: output, shape index: {}]  }
   0x1   :  { %4192 = sst [smem:[#allocation14_spill]] %s4186_s0 }
   0x2   :  { %4193 = sst [smem:[#allocation15_spill]] %s4187_s1 }
   0x3   :  { %8 = vsyncpa [#allocation3], 0 }
   0x4   :  { %10 = vsyncpa [#allocation3 + $0x1], 0 }
   0x5   :  { %11 = vsyncpa [#allocation6], 0 }
   0x6   :  { %13 = vsyncpa [#allocation6 + $0x1], 0 }
   0x7   :  { %14 = vsyncpa [#allocation4], 0 }
   0x8   :  { %16 = vsyncpa [#allocation4 + $0x1], 0  ;;  %s2477_s12 = smov 0   ;;  %s2479_s13 = smov 0  }
   0x9   :  { %s2481_s14 = smov 0   ;;  %s2483_s15 = smov 0  }
   0xa LB: > { %s2498_s16 = sadd.s32 4294967295, %s2449_s15   ;;  %s2075_s17 = sadd.s32 4294967294, %s2449_s15   ;;  %s2449_s15 = sphi %s2483_s15, %s4213_s15   ;;  %s2445_s14 = sphi %s2481_s14, %s4212_s14   ;;  %s2441_s13 = sphi %s2479_s13, %s4211_s13   ;;  %s2437_s12 = sphi %s2477_s12, %s4210_s12  }
   0xb   : > { %s2502_s18 = sadd.s32 1, %s2449_s15   ;;  %s29_s19 = sadd.s32 1, %s2445_s14 }
   0xc   : > { %s26_s20 = ssub.s32 %s2449_s15, %s2502_s18  ;;  %p36_p0 = scmp.ne.s32.totalorder %s2445_s14, %s2441_s13 }
   0xd   : > { %p27_p1 = scmp.eq.s32.totalorder %s26_s20, 0  ;;  %p37_p2 = scmp.eq.s32.totalorder %s2449_s15, 0 }
   0xe   : > { %p42_p3 = scmp.ne.s32.totalorder %s2441_s13, %s2437_s12  ;;  %p43_p4 = scmp.eq.s32.totalorder %s2498_s16, 0 }
   0xf   : > { %s2514_s21 = scalar_select %p27_p1, %s2445_s14, %s29_s19  }
  0x10   : > { %p38_p5 = por %p37_p2, %p36_p0  ;;  %p2516_p6 = por %p43_p4, %p42_p3 }
  0x11   : > { %4194 = sst [smem:[#allocation12_spill]] %s2514_s21  ;;  %p118_p7 = scmp.eq.s32.totalorder %s2498_s16, 3 }
  0x12   : > { %p124_p8 = scmp.eq.s32.totalorder %s2075_s17, 3  ;;  %p2118_p9 = scmp.lt.s32.totalorder %s2449_s15, 4 }
  0x13   : > { %p2522_p10 = por %p118_p7, %p36_p0  ;;  %s144_s25 = sand.u32 1, %s2445_s14  }
  0x14   : > { %p2526_p11 = por %p124_p8, %p42_p3  ;;  %s2532_s26 = sshll.u32 %s2449_s15, 5 }
  0x15   : > { %s2536_s27 = sshll.u32 %s144_s25, 5  ;;  %p2538_p12 = pnand %p2118_p9, %p38_p5 }
  0x16   : > { %s166_s29 = sand.u32 1, %s2449_s15   ;;  %s4199_s1 = sld [smem:[#allocation15_spill]] }
  0x17   : > { %s170_s6 = scalar_lea.vmem [#allocation5], %s2536_s27  ;;  %p2087_p13 = scmp.ge.s32.totalorder %s2449_s15, 1 }
  0x18   : > { %s178_s7 = sshll.u32 %s170_s6, 4  ;;  %s2549_s9 = scalar_lea.sflag [#allocation6], %s166_s29  ;;  %s179_s7 = int_to_ptr.vmem [resolvable:$true] %s178_s7 }
  0x19   : > { %p2293_p1 = pneg %p2538_p12 }
  0x1c   : > { %s175_s5 = scalar_lea.hbm %s4199_s1, %s2532_s26  ;;  %s2296_s20 = scalar_lea.hbm %s4199_s1, 128 }
  0x1d   : > { %s176_s8 = sshll.u32 %s175_s5, 4  ;;  %s177_s8 = int_to_ptr.hbm [resolvable:$true] %s176_s8 }
  0x1e   : > { %s2289_s10 = sshra.s32 %s177_s8, 4  ;;  %s2290_s10 = int_to_ptr.hbm [resolvable:$true] %s2289_s10 }
  0x1f   : > { %s2291_s11 = scalar_lea.hbm %s2290_s10, 32  ;;  %p2297_p4 = scmp.lt.s32.totalorder %s2290_s10, %s4199_s1 }
  0x20   : > { %p2292_p0 = scmp.ne.s32.totalorder %s2290_s10, %s2291_s11  ;;  %p2298_p5 = scmp.lt.s32.totalorder %s2296_s20, %s2291_s11 }
  0x22   : > { %p2294_p2 = pnand %p2293_p1, %p2292_p0  ;;  %p2299_p7 = por %p2298_p5, %p2297_p4 }
  0x24   : > { %p2295_p3 = pneg %p2294_p2 }
  0x26   : > { %p2300_p8 = pnand %p2299_p7, %p2295_p3 }
  0x28   : > { %2303 = shalt.err (!%p2300_p8)
}
  0x29   : > { %s4190_s29 = smov 128   ;;  %s2452_s5 = smov 8  }
  0x2a   : > { %2110 = dma.hbm_to_vmem [thread:$0]  (!%p2538_p12), %s177_s8, 512, %s179_s7, %s2549_s9, %s4190_s29, %s4190_s29, %s2452_s5  }
  0x2b   : > { %p208_p9 = scmp.lt.s32.totalorder %s2449_s15, 5  ;;  %s4200_s0 = sld [smem:[#allocation14_spill]] }
  0x2c   : > { %s148_s20 = scalar_lea.vmem [#allocation2], %s2536_s27  ;;  %s145_s4 = scalar_lea.sflag [#allocation3], %s144_s25 }
  0x2d   : > { %p2575_p0 = pnand %p2087_p13, %p208_p9  ;;  %s156_s30 = sshll.u32 %s148_s20, 4  ;;  %s157_s30 = int_to_ptr.vmem [resolvable:$true] %s156_s30 }
  0x31   : > { %s153_s11 = scalar_lea.hbm %s4200_s0, %s2532_s26  ;;  %s2326_s10 = scalar_lea.hbm %s4200_s0, 128 }
  0x32   : > { %s154_s19 = sshll.u32 %s153_s11, 4  ;;  %s155_s19 = int_to_ptr.hbm [resolvable:$true] %s154_s19 }
  0x33   : > { %s2319_s1 = sshra.s32 %s155_s19, 4  ;;  %s2320_s1 = int_to_ptr.hbm [resolvable:$true] %s2319_s1 }
  0x34   : > { %s2321_s7 = scalar_lea.hbm %s2320_s1, 32  ;;  %p2327_p13 = scmp.lt.s32.totalorder %s2320_s1, %s4200_s0 }
  0x35   : > { %p2322_p2 = scmp.ne.s32.totalorder %s2320_s1, %s2321_s7  ;;  %p2328_p5 = scmp.lt.s32.totalorder %s2326_s10, %s2321_s7 }
  0x37   : > { %p2324_p3 = pnand %p2322_p2, %p2293_p1  ;;  %p2329_p7 = por %p2328_p5, %p2327_p13 }
  0x39   : > { %p2325_p4 = pneg %p2324_p3 }
  0x3b   : > { %p2330_p8 = pnand %p2329_p7, %p2325_p4 }
  0x3d   : > { %2333 = shalt.err (!%p2330_p8)
}
  0x3e   : > { %s4202_s25 = smov 128   ;;  %s197_s6 = scalar_lea.hbm %s4188_s2, %s2532_s26 }
  0x3f   : > { %2107 = dma.hbm_to_vmem [thread:$0]  (!%p2538_p12), %s155_s19, 512, %s157_s30, %s145_s4, %s4202_s25, %s4202_s25, %s2452_s5  }
  0x40   : > { %s192_s21 = scalar_lea.vmem [#allocation7], %s2536_s27  ;;  %s198_s1 = sshll.u32 %s197_s6, 4  ;;  %s199_s1 = int_to_ptr.hbm [resolvable:$true] %s198_s1 }
  0x41   : > { %s200_s29 = sshll.u32 %s192_s21, 4  ;;  %s2349_s7 = sshra.s32 %s199_s1, 4  ;;  %s201_s29 = int_to_ptr.vmem [resolvable:$true] %s200_s29  ;;  %s2350_s7 = int_to_ptr.hbm [resolvable:$true] %s2349_s7 }
  0x42   : > { %s2351_s10 = scalar_lea.hbm %s2350_s7, 32  ;;  %s2356_s19 = scalar_lea.hbm %s4188_s2, 128 }
  0x43   : > { %p2352_p9 = scmp.ne.s32.totalorder %s2350_s7, %s2351_s10  ;;  %p2357_p4 = scmp.lt.s32.totalorder %s2350_s7, %s4188_s2 }
  0x44   : > { %p2358_p13 = scmp.lt.s32.totalorder %s2356_s19, %s2351_s10 }
  0x45   : > { %p2354_p2 = pnand %p2352_p9, %p2293_p1 }
  0x46   : > { %p2359_p5 = por %p2358_p13, %p2357_p4 }
  0x47   : > { %p2355_p3 = pneg %p2354_p2 }
  0x49   : > { %p2360_p7 = pnand %p2359_p5, %p2355_p3 }
  0x4b   : > { %2363 = shalt.err (!%p2360_p7)
}
  0x4c   : > { %2113 = dma.hbm_to_vmem [thread:$0]  (!%p2538_p12), %s199_s1, 512, %s201_s29, %s2549_s9, %s4202_s25, %s4202_s25, %s2452_s5  }
  0x4d   : > { %212 = sbr.rel (%p2575_p0) target bundleno = 717 (0x2cd), region = 32 }
  0x52   : > { %s2619_s0 = sand.u32 1, %s2441_s13  }
  0x53   : > { %s2088_s21 = sshll.u32 %s2619_s0, 5  ;;  %s215_s26 = scalar_lea.sflag [#allocation3], %s2619_s0 }
  0x54   : > { %s218_s27 = scalar_lea.vmem [#allocation2], %s2088_s21 }
  0x55   : > { %2424 = dma.done.wait (%p2516_p6), %s215_s26, 512  }
  0x56   : > { %2426 = vsyncadd (%p2516_p6), %s215_s26, 4294966784  ;;  %s224_s28 = sand.u32 1, %s2498_s16   ;;  %s228_s5 = scalar_lea.vmem [#allocation5], %s2088_s21 }
  0x57   : > { %s225_s9 = scalar_lea.sflag [#allocation6], %s224_s28 }
  0x58   : > { %2428 = dma.done.wait (%p2516_p6), %s225_s9, 1024  }
  0x59   : > { %2430 = vsyncadd (%p2516_p6), %s225_s9, 4294966272  ;;  %v276_v0 = vld [vmem:[%s218_s27 + $0x10] sm:$0xff]  ;;  %v274_v2 = vld [vmem:[%s218_s27] sm:$0xff]  ;;  %s238_s17 = scalar_lea.vmem [#allocation7], %s2088_s21  ;;  %s2453_s22 = smov 64   ;;  %vm323_vm0 = vcmask 1047556  }
  0x5a   : > { %v280_v1 = vld [vmem:[%s228_s5 + $0x10] sm:$0xff]  ;;  %v278_v4 = vld [vmem:[%s228_s5] sm:$0xff]  ;;  %v277_v5 = vld [vmem:[%s218_s27 + $0x18] sm:$0xff]  ;;  %v2454_v36 = vmov 1983009808   ;;  %vm531_vm1 = vcmask 517120   ;;  %s1962_s8 = scalar_lea.hbm %s4189_s3, %s2498_s16 }
  0x5b   : > { %v284_v3 = vsub.f32 %v276_v0, %v280_v1  ;;  %v281_v6 = vld [vmem:[%s228_s5 + $0x18] sm:$0xff]  ;;  %v282_v7 = vsub.f32 %v274_v2, %v278_v4  ;;  %v275_v8 = vld [vmem:[%s218_s27 + $0x8] sm:$0xff]  ;;  %v290_v12 = vld [vmem:[%s238_s17] sm:$0xff]  ;;  %v326_v37 = vunpack.c.l.s4 %v2454_v36  ;;  %v2455_v40 = vmov 1934713408   ;;  %s270_s6 = scalar_lea.vmem [#allocation8], %s2619_s0 }
  0x5c   : > { %v279_v9 = vld [vmem:[%s228_s5 + $0x8] sm:$0xff]  ;;  %v285_v11 = vsub.f32 %v277_v5, %v281_v6  ;;  %v294_v15 = vsub.f32 %v274_v2, %v290_v12  ;;  %v292_v21 = vld [vmem:[%s238_s17 + $0x10] sm:$0xff]  ;;  %v293_v30 = vld [vmem:[%s238_s17 + $0x18] sm:$0xff]  ;;  %v348_v41 = vunpack.c.l.s4 %v2455_v40  ;;  %s1964_s29 = sshll.u32 %s270_s6, 4  ;;  %s1966_s1 = sshll.u32 %s1962_s8, 4  ;;  %s1965_s29 = int_to_ptr.vmem [resolvable:$true] %s1964_s29  ;;  %s1967_s1 = int_to_ptr.hbm [resolvable:$true] %s1966_s1 }
  0x5d   : > { %v288_v10 = vadd.f32 1e-06, %v284_v3  ;;  %v286_v13 = vadd.f32 1e-06, %v282_v7  ;;  %v283_v14 = vsub.f32 %v275_v8, %v279_v9  ;;  %v291_v22 = vld [vmem:[%s238_s17 + $0x8] sm:$0xff]  ;;  %v296_v25 = vsub.f32 %v276_v0, %v292_v21  ;;  %s1954_s16 = scalar_lea.sflag [#allocation4], %s2619_s0 }
  0x5e   : > { %v289_v18 = vadd.f32 1e-06, %v285_v11  ;;  %v298_v19 = vadd.f32 1e-06, %v294_v15  ;;  %v295_v27 = vsub.f32 %v275_v8, %v291_v22  ;;  %v297_v33 = vsub.f32 %v277_v5, %v293_v30  ;;  %s2393_s7 = sshra.s32 %s1967_s1, 4  ;;  %s2399_s30 = scalar_lea.hbm %s4189_s3, 4  ;;  %s2394_s7 = int_to_ptr.hbm [resolvable:$true] %s2393_s7 }
  0x5f   : > { %v2632_v16 = vmul.f32 %v288_v10, %v288_v10  ;;  %v2634_v17 = vmul.f32 %v286_v13, %v286_v13  ;;  %v287_v20 = vadd.f32 1e-06, %v283_v14  ;;  %v300_v28 = vadd.f32 1e-06, %v296_v25  ;;  %s2395_s10 = scalar_lea.hbm %s2394_s7, 1  ;;  %p2400_p0 = scmp.lt.s32.totalorder %s2394_s7, %s4189_s3 }
  0x60   : > { %v2638_v23 = vmul.f32 %v289_v18, %v289_v18  ;;  %v2640_v24 = vmul.f32 %v298_v19, %v298_v19  ;;  %v299_v29 = vadd.f32 1e-06, %v295_v27  ;;  %v301_v34 = vadd.f32 1e-06, %v297_v33  ;;  %p2396_p6 = scmp.ne.s32.totalorder %s2394_s7, %s2395_s10  ;;  %p2401_p8 = scmp.lt.s32.totalorder %s2399_s30, %s2395_s10 }
  0x61   : > { %314 = vrot.lane.b32.xlu1 %v2632_v16, %s2453_s22  ;;  %310 = vrot.lane.b32.xlu0 %v2634_v17, %s2453_s22  ;;  %v2642_v26 = vmul.f32 %v287_v20, %v287_v20  ;;  %v2647_v31 = vmul.f32 %v300_v28, %v300_v28  ;;  %v2656_v38 = vunpack.c.0.s8 %v326_v37  ;;  %v2664_v45 = vunpack.c.0.s8 %v348_v41 }
  0x62   : > { %636 = vrot.lane.b32.xlu2 %v2640_v24, %s2453_s22  ;;  %v2649_v32 = vmul.f32 %v299_v29, %v299_v29  ;;  %v2653_v35 = vmul.f32 %v301_v34, %v301_v34  ;;  %v322_v9 = vrot.slane %v2634_v17, 4  ;;  %v427_v19 = vrot.slane %v2632_v16, 4  ;;  %p2397_p12 = pnand %p2396_p6, %p2522_p10  ;;  %p2402_p9 = por %p2401_p8, %p2400_p0 }
  0x63   : > { %v432_v39 = vperm.slane %v2632_v16, %v2656_v38  ;;  %v328_v42 = vperm.slane %v2634_v17, %v2656_v38  ;;  %v484_v50 = vperm.slane %v2638_v23, %v2656_v38  ;;  %v380_v54 = vperm.slane %v2642_v26, %v2656_v38 }
  0x64   : > { %v375_v13 = vrot.slane %v2642_v26, 4  ;;  %v324_v21 = vsel %vm323_vm0, 0.0, %v322_v9  ;;  %v479_v22 = vrot.slane %v2638_v23, 4  ;;  %v428_v30 = vsel %vm323_vm0, 0.0, %v427_v19  ;;  %p2398_p1 = pneg %p2397_p12 }
  0x65   : > { %v449_v43 = vrot.slane %v432_v39, 4  ;;  %v345_v48 = vrot.slane %v328_v42, 4  ;;  %v501_v59 = vrot.slane %v484_v50, 4  ;;  %v397_v1 = vrot.slane %v380_v54, 4 }
  0x66   : > { %v376_v25 = vsel %vm323_vm0, 0.0, %v375_v13  ;;  %v2723_v34 = vperm.slane %v324_v21, %v2656_v38  ;;  %v480_v40 = vsel %vm323_vm0, 0.0, %v479_v22  ;;  %p2403_p2 = pnand %p2402_p9, %p2398_p1 }
  0x69   : > { %316 = vrot.lane.b32.xlu1 %v2638_v23, %s2453_s22  ;;  %312 = vrot.lane.b32.xlu0 %v2642_v26, %s2453_s22 }
  0x71   : > { %640 = vrot.lane.b32.xlu1 %v2647_v31, %s2453_s22  ;;  %638 = vrot.lane.b32.xlu0 %v2649_v32, %s2453_s22 }
  0x79   : > { %642 = vrot.lane.b32.xlu0 %v2653_v35, %s2453_s22 }
  0xd3   : > { %v2662_v44 = vpop.permute.xlu1 %314  ;;  %v2668_v47 = vpop.permute.xlu0 %310 }
  0xd4   : > { %v442_v46 = vperm.slane %v2662_v44, %v2656_v38  ;;  %v338_v49 = vperm.slane %v2668_v47, %v2656_v38  ;;  %v333_v27 = vrot.slane %v2668_v47, 4  ;;  %v437_v23 = vrot.slane %v2662_v44, 4 }
  0xd6   : > { %v450_v51 = vsel %vm323_vm0, %v442_v46, %v449_v43  ;;  %v343_v52 = vrot.slane %v338_v49, 4  ;;  %v346_v55 = vsel %vm323_vm0, %v338_v49, %v345_v48  ;;  %v447_v7 = vrot.slane %v442_v46, 4 }
  0xd7   : > { %v2676_v53 = vperm.slane %v450_v51, %v2664_v45  ;;  %v354_v57 = vperm.slane %v346_v55, %v2664_v45  ;;  %v2736_v48 = vperm.slane %v428_v30, %v2656_v38  ;;  %v438_v49 = vsel %vm323_vm0, 0.0, %v437_v23 }
  0xd8   : > { %v344_v58 = vsel %vm323_vm0, %v343_v52, %v328_v42  ;;  %v448_v20 = vsel %vm323_vm0, %v447_v7, %v432_v39  ;;  %v384_v39 = vperm.slane %v376_v25, %v2656_v38  ;;  %v334_v42 = vsel %vm323_vm0, 0.0, %v333_v27 }
  0xd9   : > { %v586_v56 = vsel %vm531_vm1, %v2676_v53, 0.0  ;;  %v538_v60 = vsel %vm531_vm1, %v354_v57, 0.0  ;;  %v2687_v62 = vperm.slane %v344_v58, %v2664_v45  ;;  %v369_v14 = vrot.slane %v354_v57, 4 }
  0xda   : > { %587 = vadd.xlane.f32.xlu2 %v586_v56  ;;  %539 = vadd.xlane.f32.xlu0 %v538_v60  ;;  %v2716_v29 = vperm.slane %v448_v20, %v2664_v45  ;;  %v473_v44 = vrot.slane %v2676_v53, 4  ;;  %v409_v51 = vrot.slane %v384_v39, 4  ;;  %v357_v52 = vrot.slane %v2723_v34, 4 }
  0xdb   : > { %v317_v61 = vpop.permute.xlu1 %316  ;;  %v313_v0 = vpop.permute.xlu0 %312  ;;  %v532_v6 = vsel %vm531_vm1, %v2687_v62, 0.0  ;;  %v370_v26 = vsel %vm323_vm0, 0.0, %v369_v14  ;;  %v488_v57 = vperm.slane %v480_v40, %v2656_v38  ;;  %v446_v58 = vperm.slane %v438_v49, %v2656_v38 }
  0xdc   : > { %v494_v63 = vperm.slane %v317_v61, %v2656_v38  ;;  %v390_v2 = vperm.slane %v313_v0, %v2656_v38  ;;  %v385_v28 = vrot.slane %v313_v0, 4  ;;  %v489_v36 = vrot.slane %v317_v61, 4 }
  0xdd   : > { %v541_v37 = vsel %vm531_vm1, %v370_v26, 0.0  ;;  %v580_v46 = vsel %vm531_vm1, %v2716_v29, 0.0  ;;  %v474_v60 = vsel %vm323_vm0, 0.0, %v473_v44  ;;  %v461_v61 = vrot.slane %v2736_v48, 4 }
  0xde   : > { %v502_v3 = vsel %vm323_vm0, %v494_v63, %v501_v59  ;;  %v395_v4 = vrot.slane %v390_v2, 4  ;;  %v398_v8 = vsel %vm323_vm0, %v390_v2, %v397_v1  ;;  %v499_v17 = vrot.slane %v494_v63, 4 }
  0xdf   : > { %v2693_v5 = vperm.slane %v502_v3, %v2664_v45  ;;  %v406_v11 = vperm.slane %v398_v8, %v2664_v45  ;;  %v386_v43 = vsel %vm323_vm0, 0.0, %v385_v28  ;;  %v513_v2 = vrot.slane %v488_v57, 4 }
  0xe0   : > { %v396_v12 = vsel %vm323_vm0, %v395_v4, %v380_v54  ;;  %v500_v33 = vsel %vm323_vm0, %v499_v17, %v484_v50  ;;  %v490_v50 = vsel %vm323_vm0, 0.0, %v489_v36  ;;  %v342_v54 = vperm.slane %v334_v42, %v2656_v38 }
  0xe1   : > { %v610_v10 = vsel %vm531_vm1, %v2693_v5, 0.0  ;;  %v562_v15 = vsel %vm531_vm1, %v406_v11, 0.0  ;;  %v2706_v18 = vperm.slane %v396_v12, %v2664_v45  ;;  %v421_v41 = vrot.slane %v406_v11, 4 }
  0xe2   : > { %611 = vadd.xlane.f32.xlu1 %v610_v10  ;;  %533 = vadd.xlane.f32.xlu2 %v532_v6  ;;  %v506_v47 = vperm.slane %v500_v33, %v2664_v45  ;;  %v394_v55 = vperm.slane %v386_v43, %v2656_v38  ;;  %v498_v59 = vperm.slane %v490_v50, %v2656_v38  ;;  %v589_v3 = vsel %vm531_vm1, %v474_v60, 0.0  ;;  %v637_v33 = vpop.permute.xlu2 %636 }
  0xe3   : > { %563 = vadd.xlane.f32.xlu0 %v562_v15  ;;  %v556_v16 = vsel %vm531_vm1, %v2706_v18, 0.0  ;;  %v422_v56 = vsel %vm323_vm0, 0.0, %v421_v41  ;;  %v358_v1 = vsel %vm323_vm0, %v342_v54, %v357_v52  ;;  %v462_v4 = vsel %vm323_vm0, %v446_v58, %v461_v61 }
  0xe4   : > { %v604_v53 = vsel %vm531_vm1, %v506_v47, 0.0  ;;  %v565_v63 = vsel %vm531_vm1, %v422_v56, 0.0  ;;  %v410_v0 = vsel %vm323_vm0, %v394_v55, %v409_v51  ;;  %v2756_v6 = vsel %vm323_vm0, %v498_v59, %v513_v2 }
  0xe5   : > { %v2759_v7 = vperm.slane %v410_v0, %v2664_v45  ;;  %v2762_v8 = vperm.slane %v358_v1, %v2664_v45  ;;  %v2765_v9 = vperm.slane %v462_v4, %v2664_v45  ;;  %v407_v10 = vrot.slane %v394_v55, 4 }
  0xe6   : > { %v525_v13 = vrot.slane %v2693_v5, 4  ;;  %v367_v14 = vrot.slane %v2687_v62, 4  ;;  %v523_v19 = vrot.slane %v506_v47, 4  ;;  %v355_v20 = vrot.slane %v342_v54, 4 }
  0xe7   : > { %v574_v11 = vsel %vm531_vm1, %v2759_v7, 0.0  ;;  %v550_v12 = vsel %vm531_vm1, %v2762_v8, 0.0  ;;  %v598_v15 = vsel %vm531_vm1, %v2765_v9, 0.0  ;;  %v408_v17 = vsel %vm323_vm0, %v407_v10, %v384_v39  ;;  %v639_v10 = vpop.permute.xlu0 %638 }
  0xe8   : > { %v526_v21 = vsel %vm323_vm0, 0.0, %v525_v13  ;;  %v368_v22 = vsel %vm323_vm0, 0.0, %v367_v14  ;;  %v524_v25 = vsel %vm323_vm0, 0.0, %v523_v19  ;;  %v414_v26 = vperm.slane %v408_v17, %v2664_v45 }
  0xe9   : > { %v511_v27 = vrot.slane %v498_v59, 4  ;;  %v613_v5 = vsel %vm531_vm1, %v526_v21, 0.0  ;;  %v535_v62 = vsel %vm531_vm1, %v368_v22, 0.0  ;;  %v471_v28 = vrot.slane %v2716_v29, 4 }
  0xea   : > { %542 = vadd.xlane.f32.xlu1 %v541_v37  ;;  %557 = vadd.xlane.f32.xlu2 %v556_v16  ;;  %v356_v16 = vsel %vm323_vm0, %v355_v20, %v2723_v34  ;;  %v607_v30 = vsel %vm531_vm1, %v524_v25, 0.0  ;;  %v423_v23 = vrot.slane %v414_v26, 4  ;;  %v459_v39 = vrot.slane %v446_v58, 4 }
  0xeb   : > { %581 = vadd.xlane.f32.xlu0 %v580_v46  ;;  %v2787_v36 = vperm.slane %v356_v16, %v2664_v45  ;;  %v512_v37 = vsel %vm323_vm0, %v511_v27, %v488_v57  ;;  %v472_v40 = vsel %vm323_vm0, 0.0, %v471_v28  ;;  %v658_v41 = vrot.slane %v637_v33, 4 }
  0xec   : > { %v424_v42 = vsel %vm323_vm0, 0.0, %v423_v23  ;;  %v2793_v29 = vperm.slane %v512_v37, %v2664_v45  ;;  %v583_v34 = vsel %vm531_vm1, %v472_v40, 0.0  ;;  %v460_v47 = vsel %vm323_vm0, %v459_v39, %v2736_v48 }
  0xed   : > { %v544_v43 = vsel %vm531_vm1, %v2787_v36, 0.0  ;;  %v659_v46 = vsel %vm323_vm0, 0.0, %v658_v41  ;;  %v419_v44 = vrot.slane %v2706_v18, 4  ;;  %v571_v49 = vsel %vm531_vm1, %v424_v42, 0.0 }
  0xee   : > { %v648_v50 = vrot.slane %v2640_v24, 4  ;;  %v653_v51 = vperm.slane %v2640_v24, %v2656_v38  ;;  %v527_v52 = vrot.slane %v2793_v29, 4  ;;  %v667_v54 = vperm.slane %v659_v46, %v2656_v38 }
  0xef   : > { %v2809_v55 = vperm.slane %v460_v47, %v2664_v45  ;;  %v420_v56 = vsel %vm323_vm0, 0.0, %v419_v44  ;;  %v663_v18 = vperm.slane %v637_v33, %v2656_v38  ;;  %v477_v60 = vrot.slane %v2765_v9, 4 }
  0xf0   : > { %v649_v48 = vsel %vm323_vm0, 0.0, %v648_v50  ;;  %v528_v57 = vsel %vm323_vm0, 0.0, %v527_v52  ;;  %v680_v58 = vrot.slane %v667_v54, 4  ;;  %v559_v59 = vsel %vm531_vm1, %v420_v56, 0.0 }
  0xf1   : > { %v592_v24 = vsel %vm531_vm1, %v2809_v55, 0.0  ;;  %v619_v61 = vsel %vm531_vm1, %v528_v57, 0.0  ;;  %v668_v2 = vrot.slane %v663_v18, 4  ;;  %v715_v13 = vperm.slane %v639_v10, %v2656_v38 }
  0xf2   : > { %566 = vadd.xlane.f32.xlu1 %v565_v63  ;;  %605 = vadd.xlane.f32.xlu2 %v604_v53  ;;  %v670_v53 = vrot.slane %v653_v51, 4  ;;  %v657_v63 = vperm.slane %v649_v48, %v2656_v38  ;;  %v705_v20 = vperm.slane %v2649_v32, %v2656_v38  ;;  %v425_v16 = vrot.slane %v2759_v7, 4 }
  0xf3   : > { %590 = vadd.xlane.f32.xlu0 %v589_v3  ;;  %v478_v3 = vsel %vm323_vm0, 0.0, %v477_v60  ;;  %v669_v14 = vsel %vm323_vm0, %v668_v2, %v653_v51  ;;  %v720_v22 = vrot.slane %v715_v13, 4  ;;  %v710_v39 = vrot.slane %v639_v10, 4 }
  0xf4   : > { %v671_v0 = vsel %vm323_vm0, %v663_v18, %v670_v53  ;;  %v681_v1 = vsel %vm323_vm0, %v680_v58, %v657_v63  ;;  %v601_v9 = vsel %vm531_vm1, %v478_v3, 0.0  ;;  %v2838_v21 = vperm.slane %v669_v14, %v2664_v45 }
  0xf5   : > { %v2825_v4 = vperm.slane %v671_v0, %v2664_v45  ;;  %v682_v27 = vrot.slane %v657_v63, 4  ;;  %v721_v28 = vsel %vm323_vm0, %v720_v22, %v705_v20  ;;  %v426_v41 = vsel %vm323_vm0, 0.0, %v425_v16 }
  0xf6   : > { %v2852_v40 = vperm.slane %v721_v28, %v2664_v45  ;;  %v711_v7 = vsel %vm323_vm0, 0.0, %v710_v39  ;;  %v577_v44 = vsel %vm531_vm1, %v426_v41, 0.0  ;;  %v371_v51 = vrot.slane %v2787_v36, 4 }
  0xf7   : > { %v862_v19 = vsel %vm531_vm1, %v2825_v4, 0.0  ;;  %v683_v37 = vsel %vm323_vm0, %v667_v54, %v682_v27  ;;  %v719_v54 = vperm.slane %v711_v7, %v2656_v38 }
  0xf8   : > { %v880_v46 = vsel %vm531_vm1, %v2852_v40, 0.0  ;;  %v372_v53 = vsel %vm323_vm0, 0.0, %v371_v51 }
  0xf9   : > { %v732_v48 = vrot.slane %v719_v54, 4 }
  0xfa   : > { %575 = vadd.xlane.f32.xlu1 %v574_v11  ;;  %551 = vadd.xlane.f32.xlu2 %v550_v12  ;;  %v687_v11 = vperm.slane %v681_v1, %v2664_v45  ;;  %v568_v12 = vsel %vm531_vm1, %v414_v26, 0.0  ;;  %v722_v26 = vrot.slane %v705_v20, 4  ;;  %v475_v1 = vrot.slane %v2809_v55, 4 }
  0xfb   : > { %599 = vadd.xlane.f32.xlu0 %v598_v15  ;;  %v373_v15 = vrot.slane %v2762_v8, 4  ;;  %v856_v8 = vsel %vm531_vm1, %v2838_v21, 0.0 }
  0xfc   : > { %v696_v17 = vrot.slane %v687_v11, 4  ;;  %v723_v33 = vsel %vm323_vm0, %v715_v13, %v722_v26  ;;  %v868_v47 = vsel %vm531_vm1, %v687_v11, 0.0 }
  0xfd   : > { %v374_v25 = vsel %vm323_vm0, 0.0, %v373_v15  ;;  %v731_v42 = vperm.slane %v723_v33, %v2664_v45  ;;  %v616_v33 = vsel %vm531_vm1, %v2793_v29, 0.0 }
  0xff   : > { %v886_v55 = vsel %vm531_vm1, %v731_v42, 0.0 }
 0x102   : > { %614 = vadd.xlane.f32.xlu1 %v613_v5  ;;  %536 = vadd.xlane.f32.xlu2 %v535_v62  ;;  %v697_v5 = vsel %vm323_vm0, 0.0, %v696_v17  ;;  %v553_v62 = vsel %vm531_vm1, %v374_v25, 0.0 }
 0x103   : > { %608 = vadd.xlane.f32.xlu0 %v607_v30  ;;  %v700_v30 = vrot.slane %v2649_v32, 4  ;;  %v871_v23 = vsel %vm531_vm1, %v697_v5, 0.0 }
 0x105   : > { %v701_v32 = vsel %vm323_vm0, 0.0, %v700_v30 }
 0x106   : > { %v709_v52 = vperm.slane %v701_v32, %v2656_v38 }
 0x108   : > { %v734_v58 = vrot.slane %v709_v52, 4  ;;  %v733_v63 = vsel %vm323_vm0, %v732_v48, %v709_v52 }
 0x109   : > { %v2883_v10 = vperm.slane %v733_v63, %v2664_v45 }
 0x10a   : > { %584 = vadd.xlane.f32.xlu1 %v583_v34  ;;  %545 = vadd.xlane.f32.xlu2 %v544_v43  ;;  %v2857_v34 = vperm.slane %v683_v37, %v2664_v45  ;;  %v641_v43 = vpop.permute.xlu1 %640  ;;  %v735_v0 = vsel %vm323_vm0, %v719_v54, %v734_v58  ;;  %v692_v37 = vrot.slane %v2838_v21, 4 }
 0x10b   : > { %572 = vadd.xlane.f32.xlu0 %v571_v49  ;;  %v746_v49 = vrot.slane %v731_v42, 4  ;;  %v767_v56 = vperm.slane %v641_v43, %v2656_v38  ;;  %v762_v2 = vrot.slane %v641_v43, 4  ;;  %v2886_v11 = vperm.slane %v735_v0, %v2664_v45  ;;  %v643_v42 = vpop.permute.xlu0 %642 }
 0x10c   : > { %v698_v50 = vrot.slane %v2857_v34, 4  ;;  %v748_v15 = vrot.slane %v2883_v10, 4  ;;  %v693_v7 = vsel %vm323_vm0, 0.0, %v692_v37  ;;  %v819_v51 = vperm.slane %v643_v42, %v2656_v38 }
 0x10d   : > { %v747_v18 = vsel %vm323_vm0, 0.0, %v746_v49  ;;  %v763_v14 = vsel %vm323_vm0, 0.0, %v762_v2 }
 0x10e   : > { %v699_v57 = vsel %vm323_vm0, 0.0, %v698_v50  ;;  %v889_v36 = vsel %vm531_vm1, %v747_v18, 0.0  ;;  %v771_v20 = vperm.slane %v763_v14, %v2656_v38  ;;  %v749_v25 = vsel %vm323_vm0, 0.0, %v748_v15 }
 0x10f   : > { %v877_v60 = vsel %vm531_vm1, %v699_v57, 0.0  ;;  %v694_v50 = vrot.slane %v2825_v4, 4  ;;  %v824_v54 = vrot.slane %v819_v51, 4  ;;  %v814_v14 = vrot.slane %v643_v42, 4 }
 0x110   : > { %v784_v5 = vrot.slane %v771_v20, 4  ;;  %v744_v15 = vrot.slane %v2852_v40, 4  ;;  %v750_v42 = vrot.slane %v2886_v11, 4 }
 0x111   : > { %v695_v18 = vsel %vm323_vm0, 0.0, %v694_v50 }
 0x112   : > { %593 = vadd.xlane.f32.xlu1 %v592_v24  ;;  %560 = vadd.xlane.f32.xlu2 %v559_v59  ;;  %v757_v24 = vperm.slane %v2647_v31, %v2656_v38  ;;  %v772_v59 = vrot.slane %v767_v56, 4  ;;  %v865_v4 = vsel %vm531_vm1, %v695_v18, 0.0 }
 0x113   : > { %620 = vadd.xlane.f32.xlu0 %v619_v61  ;;  %v547_v61 = vsel %vm531_vm1, %v372_v53, 0.0 }
 0x114   : > { %v773_v3 = vsel %vm323_vm0, %v772_v59, %v757_v24  ;;  %v774_v26 = vrot.slane %v757_v24, 4 }
 0x115   : > { %v779_v13 = vperm.slane %v773_v3, %v2664_v45 }
 0x116   : > { %v775_v16 = vsel %vm323_vm0, %v767_v56, %v774_v26 }
 0x117   : > { %v2911_v41 = vperm.slane %v775_v16, %v2664_v45  ;;  %v904_v43 = vsel %vm531_vm1, %v779_v13, 0.0 }
 0x11a   : > { %602 = vadd.xlane.f32.xlu1 %v601_v9  ;;  %569 = vadd.xlane.f32.xlu2 %v568_v12  ;;  %v752_v9 = vrot.slane %v2647_v31, 4  ;;  %v476_v12 = vsel %vm323_vm0, 0.0, %v475_v1  ;;  %v796_v31 = vrot.slane %v779_v13, 4 }
 0x11b   : > { %863 = vadd.xlane.f32.xlu0 %v862_v19  ;;  %v898_v19 = vsel %vm531_vm1, %v2886_v11, 0.0  ;;  %v595_v17 = vsel %vm531_vm1, %v476_v12, 0.0 }
 0x11c   : > { %v753_v22 = vsel %vm323_vm0, 0.0, %v752_v9  ;;  %v522_v9 = vperm.slane %v2756_v6, %v2664_v45 }
 0x11d   : > { %v761_v27 = vperm.slane %v753_v22, %v2656_v38 }
 0x11e   : > { %v622_v37 = vsel %vm531_vm1, %v522_v9, 0.0 }
 0x11f   : > { %v786_v28 = vrot.slane %v761_v27, 4 }
 0x121   : > { %v787_v39 = vsel %vm323_vm0, %v771_v20, %v786_v28  ;;  %v815_v20 = vsel %vm323_vm0, 0.0, %v814_v14 }
 0x122   : > { %857 = vadd.xlane.f32.xlu1 %v856_v8  ;;  %554 = vadd.xlane.f32.xlu2 %v553_v62  ;;  %v797_v8 = vsel %vm323_vm0, 0.0, %v796_v31  ;;  %v895_v62 = vsel %vm531_vm1, %v749_v25, 0.0  ;;  %v795_v29 = vperm.slane %v787_v39, %v2664_v45  ;;  %v745_v25 = vsel %vm323_vm0, 0.0, %v744_v15 }
 0x123   : > { %872 = vadd.xlane.f32.xlu0 %v871_v23  ;;  %v907_v30 = vsel %vm531_vm1, %v797_v8, 0.0  ;;  %v785_v23 = vsel %vm323_vm0, %v784_v5, %v761_v27  ;;  %v823_v40 = vperm.slane %v815_v20, %v2656_v38  ;;  %v883_v8 = vsel %vm531_vm1, %v745_v25, 0.0 }
 0x124   : > { %v2914_v32 = vperm.slane %v785_v23, %v2664_v45  ;;  %v802_v49 = vrot.slane %v795_v29, 4  ;;  %v922_v3 = vsel %vm531_vm1, %v795_v29, 0.0  ;;  %v892_v39 = vsel %vm531_vm1, %v2883_v10, 0.0 }
 0x125   : > { %v836_v23 = vrot.slane %v823_v40, 4  ;;  %v751_v10 = vsel %vm323_vm0, 0.0, %v750_v42 }
 0x126   : > { %v916_v21 = vsel %vm531_vm1, %v2914_v32, 0.0  ;;  %v803_v48 = vsel %vm323_vm0, 0.0, %v802_v49  ;;  %v901_v50 = vsel %vm531_vm1, %v751_v10, 0.0 }
 0x127   : > { %v925_v24 = vsel %vm531_vm1, %v803_v48, 0.0 }
 0x12a   : > { %869 = vadd.xlane.f32.xlu1 %v868_v47  ;;  %578 = vadd.xlane.f32.xlu2 %v577_v44  ;;  %v859_v47 = vsel %vm531_vm1, %v693_v7, 0.0  ;;  %v809_v44 = vperm.slane %v2653_v35, %v2656_v38 }
 0x12b   : > { %881 = vadd.xlane.f32.xlu0 %v880_v46  ;;  %v798_v46 = vrot.slane %v2911_v41, 4 }
 0x12c   : > { %v826_v57 = vrot.slane %v809_v44, 4  ;;  %v825_v59 = vsel %vm323_vm0, %v824_v54, %v809_v44 }
 0x12d   : > { %v799_v52 = vsel %vm323_vm0, 0.0, %v798_v46 }
 0x12e   : > { %v913_v58 = vsel %vm531_vm1, %v799_v52, 0.0 }
 0x132   : > { %878 = vadd.xlane.f32.xlu1 %v877_v60  ;;  %548 = vadd.xlane.f32.xlu2 %v547_v61  ;;  %v2940_v60 = vperm.slane %v825_v59, %v2664_v45  ;;  %v804_v61 = vrot.slane %v2653_v35, 4 }
 0x133   : > { %890 = vadd.xlane.f32.xlu0 %v889_v36  ;;  %v827_v36 = vsel %vm323_vm0, %v819_v51, %v826_v57 }
 0x134   : > { %v2948_v1 = vperm.slane %v827_v36, %v2664_v45  ;;  %v848_v12 = vrot.slane %v2940_v60, 4  ;;  %v805_v13 = vsel %vm323_vm0, 0.0, %v804_v61  ;;  %v910_v36 = vsel %vm531_vm1, %v2911_v41, 0.0 }
 0x135   : > { %v813_v6 = vperm.slane %v805_v13, %v2656_v38 }
 0x136   : > { %v934_v35 = vsel %vm531_vm1, %v2948_v1, 0.0 }
 0x137   : > { %v838_v5 = vrot.slane %v813_v6, 4  ;;  %v837_v46 = vsel %vm323_vm0, %v836_v23, %v813_v6 }
 0x138   : > { %v3008_v44 = vperm.slane %v837_v46, %v2664_v45 }
 0x139   : > { %v839_v28 = vsel %vm323_vm0, %v823_v40, %v838_v5 }
 0x13a   : > { %887 = vadd.xlane.f32.xlu1 %v886_v55  ;;  %596 = vadd.xlane.f32.xlu2 %v595_v17  ;;  %v874_v55 = vsel %vm531_vm1, %v2857_v34, 0.0  ;;  %v849_v17 = vsel %vm323_vm0, 0.0, %v848_v12  ;;  %v2986_v38 = vperm.slane %v839_v28, %v2664_v45  ;;  %v852_v18 = vrot.slane %v3008_v44, 4 }
 0x13b   : > { %899 = vadd.xlane.f32.xlu0 %v898_v19  ;;  %v529_v19 = vrot.slane %v522_v9, 4  ;;  %v931_v34 = vsel %vm531_vm1, %v849_v17, 0.0  ;;  %v800_v9 = vrot.slane %v2914_v32, 4 }
 0x13c   : > { %v946_v7 = vsel %vm531_vm1, %v2986_v38, 0.0 }
 0x13d   : > { %v530_v27 = vsel %vm323_vm0, 0.0, %v529_v19  ;;  %v801_v25 = vsel %vm323_vm0, 0.0, %v800_v9 }
 0x13e   : > { %v919_v10 = vsel %vm531_vm1, %v801_v25, 0.0 }
 0x142   : > { %896 = vadd.xlane.f32.xlu1 %v895_v62  ;;  %617 = vadd.xlane.f32.xlu2 %v616_v33  ;;  %v625_v62 = vsel %vm531_vm1, %v530_v27, 0.0 }
 0x143   : > { %908 = vadd.xlane.f32.xlu0 %v907_v30 }
 0x14a   : > { %905 = vadd.xlane.f32.xlu1 %v904_v43  ;;  %860 = vadd.xlane.f32.xlu2 %v859_v47 }
 0x14b   : > { %917 = vadd.xlane.f32.xlu0 %v916_v21 }
 0x14d   : > { %v2928_v56 = vpop.xlane.xlu2 %587  ;;  %v2932_v53 = vpop.xlane.xlu0 %539 }
 0x14e   : > { %2161 = vrsqrt.f32 %v2928_v56  ;;  %vm1175_vm2 = vcmp.eq.f32.partialorder %v2928_v56, inf  ;;  %vm1177_vm3 = vcmp.eq.f32.partialorder %v2928_v56, 0.0  ;;  %vm983_vm4 = vcmp.eq.f32.partialorder %v2932_v53, inf }
 0x14f   : > { %2163 = vrsqrt.f32 %v2932_v53  ;;  %vm985_vm7 = vcmp.eq.f32.partialorder %v2932_v53, 0.0 }
 0x152   : > { %914 = vadd.xlane.f32.xlu1 %v913_v58  ;;  %866 = vadd.xlane.f32.xlu2 %v865_v4 }
 0x153   : > { %926 = vadd.xlane.f32.xlu0 %v925_v24 }
 0x154   : > { %v2162_v29 = vpop.eup %2161 }
 0x155   : > { %v2943_v63 = vpop.xlane.xlu1 %611  ;;  %v2945_v0 = vpop.xlane.xlu2 %533  ;;  %v1169_v21 = vmul.f32 %v2162_v29, %v2928_v56 }
 0x156   : > { %v2950_v2 = vpop.xlane.xlu0 %563  ;;  %2165 = vrsqrt.f32 %v2943_v63  ;;  %v3010_v49 = vpop.eup %2163  ;;  %v962_v9 = vand.u32 2147483648, %v2945_v0  ;;  %vm1271_vm5 = vcmp.eq.f32.partialorder %v2943_v63, inf  ;;  %vm959_vm6 = vcmp.eq.f32.partialorder %v2945_v0, inf }
 0x157   : > { %2167 = vrsqrt.f32 %v2945_v0  ;;  %v1170_v54 = vmul.f32 %v2162_v29, %v1169_v21  ;;  %v977_v48 = vmul.f32 %v3010_v49, %v2932_v53  ;;  %vm1273_vm8 = vcmp.eq.f32.partialorder %v2943_v63, 0.0 }
 0x158   : > { %2169 = vrsqrt.f32 %v2950_v2  ;;  %vm1079_vm9 = vcmp.eq.f32.partialorder %v2950_v2, inf  ;;  %vm961_vm10 = vcmp.eq.f32.partialorder %v2945_v0, 0.0  ;;  %vm1081_vm11 = vcmp.eq.f32.partialorder %v2950_v2, 0.0 }
 0x159   : > { %v1171_v4 = vmul.f32 0.5, %v1170_v54  ;;  %v978_v61 = vmul.f32 %v3010_v49, %v977_v48 }
 0x15a   : > { %923 = vadd.xlane.f32.xlu1 %v922_v3  ;;  %875 = vadd.xlane.f32.xlu2 %v874_v55  ;;  %v853_v3 = vsel %vm323_vm0, 0.0, %v852_v18 }
 0x15b   : > { %935 = vadd.xlane.f32.xlu0 %v934_v35  ;;  %v943_v14 = vsel %vm531_vm1, %v853_v3, 0.0  ;;  %v1172_v15 = vsub.f32 1.5, %v1171_v4  ;;  %v979_v19 = vmul.f32 0.5, %v978_v61  ;;  %v928_v4 = vsel %vm531_vm1, %v2940_v60, 0.0 }
 0x15c   : > { %v3013_v51 = vpop.eup %2165  ;;  %v1274_v61 = vand.u32 2147483648, %v2943_v63  ;;  %v1082_v3 = vand.u32 2147483648, %v2950_v2 }
 0x15d   : > { %v2965_v31 = vpop.xlane.xlu1 %542  ;;  %v2967_v22 = vpop.xlane.xlu2 %557  ;;  %v1265_v45 = vmul.f32 %v3013_v51, %v2943_v63  ;;  %v1173_v23 = vmul.f32 %v2162_v29, %v1172_v15  ;;  %v980_v42 = vsub.f32 1.5, %v979_v19 }
 0x15e   : > { %v2970_v26 = vpop.xlane.xlu0 %581  ;;  %v3015_v52 = vpop.eup %2167  ;;  %2171 = vrsqrt.f32 %v2965_v31  ;;  %vm995_vm12 = vcmp.eq.f32.partialorder %v2965_v31, inf  ;;  %vm997_vm14 = vcmp.eq.f32.partialorder %v2965_v31, 0.0 }
 0x15f   : > { %2173 = vrsqrt.f32 %v2970_v26  ;;  %v3026_v58 = vpop.eup %2169  ;;  %v953_v24 = vmul.f32 %v3015_v52, %v2945_v0  ;;  %v1266_v12 = vmul.f32 %v3013_v51, %v1265_v45  ;;  %vm1151_vm13 = vcmp.eq.f32.partialorder %v2970_v26, inf }
 0x160   : > { %2175 = vrsqrt.f32 %v2967_v22  ;;  %v1073_v13 = vmul.f32 %v3026_v58, %v2950_v2  ;;  %vm1153_vm15 = vcmp.eq.f32.partialorder %v2970_v26, 0.0 }
 0x161   : > { %v954_v55 = vmul.f32 %v3015_v52, %v953_v24  ;;  %v1267_v17 = vmul.f32 0.5, %v1266_v12 }
 0x162   : > { %932 = vadd.xlane.f32.xlu1 %v931_v34  ;;  %884 = vadd.xlane.f32.xlu2 %v883_v8  ;;  %v1074_v6 = vmul.f32 %v3026_v58, %v1073_v13 }
 0x163   : > { %626 = vadd.xlane.f32.xlu0 %v625_v62  ;;  %v955_v40 = vmul.f32 0.5, %v954_v55  ;;  %v981_v55 = vmul.f32 %v3010_v49, %v980_v42 }
 0x164   : > { %v3045_v41 = vpop.eup %2171  ;;  %v1075_v46 = vmul.f32 0.5, %v1074_v6 }
 0x165   : > { %v2978_v16 = vpop.xlane.xlu1 %566  ;;  %v2980_v30 = vpop.xlane.xlu2 %605  ;;  %v989_v5 = vmul.f32 %v3045_v41, %v2965_v31  ;;  %v956_v21 = vsub.f32 1.5, %v955_v40 }
 0x166   : > { %v2983_v33 = vpop.xlane.xlu0 %590  ;;  %2177 = vrsqrt.f32 %v2978_v16  ;;  %v3049_v32 = vpop.eup %2173  ;;  %v1076_v15 = vsub.f32 1.5, %v1075_v46 }
 0x167   : > { %2179 = vrsqrt.f32 %v2983_v33  ;;  %v3056_v34 = vpop.eup %2175  ;;  %v1145_v27 = vmul.f32 %v3049_v32, %v2970_v26  ;;  %v990_v54 = vmul.f32 %v3045_v41, %v989_v5 }
 0x168   : > { %2181 = vrsqrt.f32 %v2980_v30  ;;  %v1049_v48 = vmul.f32 %v3056_v34, %v2967_v22  ;;  %v1077_v46 = vmul.f32 %v3026_v58, %v1076_v15 }
 0x169   : > { %v991_v25 = vmul.f32 0.5, %v990_v54 }
 0x16a   : > { %623 = vadd.xlane.f32.xlu1 %v622_v37  ;;  %893 = vadd.xlane.f32.xlu2 %v892_v39  ;;  %v1178_v37 = vand.u32 2147483648, %v2928_v56  ;;  %v850_v39 = vrot.slane %v2948_v1, 4  ;;  %v986_v1 = vand.u32 2147483648, %v2932_v53  ;;  %v1050_v40 = vmul.f32 %v3056_v34, %v1049_v48 }
 0x16b   : > { %947 = vadd.xlane.f32.xlu0 %v946_v7  ;;  %v1268_v7 = vsub.f32 1.5, %v1267_v17  ;;  %v957_v17 = vmul.f32 %v3015_v52, %v956_v21  ;;  %v3132_v21 = vsel %vm531_vm1, %v3008_v44, 0.0 }
 0x16c   : > { %v3063_v8 = vpop.eup %2177  ;;  %v851_v12 = vsel %vm323_vm0, 0.0, %v850_v39  ;;  %v854_v39 = vrot.slane %v2986_v38, 4 }
 0x16d   : > { %v2997_v43 = vpop.xlane.xlu1 %575  ;;  %v3004_v47 = vpop.xlane.xlu2 %551  ;;  %v1085_v45 = vmul.f32 %v3063_v8, %v2978_v16  ;;  %v1269_v60 = vmul.f32 %v3013_v51, %v1268_v7  ;;  %v982_v7 = vmul.f32 %v981_v55, %v2932_v53  ;;  %v958_v54 = vmul.f32 %v957_v17, %v2945_v0 }
 0x16e   : > { %v3002_v11 = vpop.xlane.xlu0 %599  ;;  %2183 = vrsqrt.f32 %v2997_v43  ;;  %v3068_v28 = vpop.eup %2179  ;;  %v1078_v17 = vmul.f32 %v1077_v46, %v2950_v2 }
 0x16f   : > { %2185 = vrsqrt.f32 %v3002_v11  ;;  %v3078_v29 = vpop.eup %2181  ;;  %v1181_v18 = vmul.f32 %v3068_v28, %v2983_v33  ;;  %v1086_v49 = vmul.f32 %v3063_v8, %v1085_v45  ;;  %v1051_v45 = vmul.f32 0.5, %v1050_v40 }
 0x170   : > { %v1241_v51 = vmul.f32 %v3078_v29, %v2980_v30  ;;  %2187 = vrsqrt.f32 %v3004_v47  ;;  %v984_v15 = vsel %vm983_vm4, %v2932_v53, %v982_v7  ;;  %v960_v40 = vsel %vm959_vm6, %v2945_v0, %v958_v54 }
 0x171   : > { %v3173_v46 = vsel %vm985_vm7, %v986_v1, %v984_v15  ;;  %v1058_v53 = vand.u32 2147483648, %v2967_v22  ;;  %v1190_v1 = vand.u32 2147483648, %v2983_v33  ;;  %vm1187_vm4 = vcmp.eq.f32.partialorder %v2983_v33, inf }
 0x172   : > { %902 = vadd.xlane.f32.xlu2 %v901_v50  ;;  %944 = vadd.xlane.f32.xlu1 %v943_v14  ;;  %v1146_v50 = vmul.f32 %v3049_v32, %v1145_v27  ;;  %v1174_v14 = vmul.f32 %v1173_v23, %v2928_v56  ;;  %v1182_v27 = vmul.f32 %v3068_v28, %v1181_v18  ;;  %v937_v23 = vsel %vm531_vm1, %v851_v12, 0.0 }
 0x173   : > { %v992_v18 = vsub.f32 1.5, %v991_v25  ;;  %v1242_v58 = vmul.f32 %v3078_v29, %v1241_v51  ;;  %v1052_v51 = vsub.f32 1.5, %v1051_v45  ;;  %v3196_v45 = vsel %vm961_vm10, %v962_v9, %v960_v40 }
 0x174   : > { %v1147_v6 = vmul.f32 0.5, %v1146_v50  ;;  %v1176_v42 = vsel %vm1175_vm2, %v2928_v56, %v1174_v14  ;;  %v1270_v50 = vmul.f32 %v1269_v60, %v2943_v63  ;;  %v1183_v12 = vmul.f32 0.5, %v1182_v27 }
 0x175   : > { %v3024_v57 = vpop.xlane.xlu1 %614  ;;  %v3043_v35 = vpop.xlane.xlu2 %536  ;;  %v1087_v14 = vmul.f32 0.5, %v1086_v49  ;;  %v3141_v55 = vsel %vm1177_vm3, %v1178_v37, %v1176_v42  ;;  %v1154_v56 = vand.u32 2147483648, %v2970_v26  ;;  %v998_v37 = vand.u32 2147483648, %v2965_v31 }
 0x176   : > { %v3030_v59 = vpop.xlane.xlu0 %608  ;;  %v1148_v48 = vsub.f32 1.5, %v1147_v6  ;;  %v1272_v25 = vsel %vm1271_vm5, %v2943_v63, %v1270_v50  ;;  %v993_v49 = vmul.f32 %v3045_v41, %v992_v18  ;;  %v1243_v42 = vmul.f32 0.5, %v1242_v58 }
 0x177   : > { %2189 = vrsqrt.f32 %v3030_v59  ;;  %v3182_v41 = vsel %vm1273_vm8, %v1274_v61, %v1272_v25  ;;  %vm1055_vm2 = vcmp.eq.f32.partialorder %v2967_v22, inf  ;;  %vm1091_vm3 = vcmp.eq.f32.partialorder %v2978_v16, inf }
 0x178   : > { %v1149_v27 = vmul.f32 %v3049_v32, %v1148_v48  ;;  %v1080_v48 = vsel %vm1079_vm9, %v2950_v2, %v1078_v17  ;;  %v994_v61 = vmul.f32 %v993_v49, %v2965_v31  ;;  %2191 = vrsqrt.f32 %v3043_v35 }
 0x179   : > { %v1244_v9 = vsub.f32 1.5, %v1243_v42  ;;  %2193 = vrsqrt.f32 %v3024_v57  ;;  %vm1057_vm5 = vcmp.eq.f32.partialorder %v2967_v22, 0.0  ;;  %vm1247_vm6 = vcmp.eq.f32.partialorder %v2980_v30, inf }
 0x17a   : > { %911 = vadd.xlane.f32.xlu2 %v910_v36  ;;  %v3090_v36 = vpop.eup %2183  ;;  %v1150_v63 = vmul.f32 %v1149_v27, %v2970_v26  ;;  %v1250_v17 = vand.u32 2147483648, %v2980_v30  ;;  %vm1189_vm7 = vcmp.eq.f32.partialorder %v2983_v33, 0.0  ;;  %vm1093_vm8 = vcmp.eq.f32.partialorder %v2978_v16, 0.0 }
 0x17b   : > { %v3097_v13 = vpop.eup %2185  ;;  %v1121_v5 = vmul.f32 %v3090_v36, %v2997_v43  ;;  %v1245_v40 = vmul.f32 %v3078_v29, %v1244_v9  ;;  %vm1249_vm9 = vcmp.eq.f32.partialorder %v2980_v30, 0.0  ;;  %vm1223_vm10 = vcmp.eq.f32.partialorder %v3002_v11, inf }
 0x17c   : > { %v1217_v52 = vmul.f32 %v3097_v13, %v3002_v11  ;;  %v1152_v2 = vsel %vm1151_vm13, %v2970_v26, %v1150_v63  ;;  %vm1225_vm13 = vcmp.eq.f32.partialorder %v3002_v11, 0.0 }
 0x17d   : > { %v3053_v20 = vpop.xlane.xlu1 %584  ;;  %v3086_v24 = vpop.xlane.xlu2 %545  ;;  %v1122_v60 = vmul.f32 %v3090_v36, %v1121_v5  ;;  %v1088_v5 = vsub.f32 1.5, %v1087_v14 }
 0x17e   : > { %v3066_v62 = vpop.xlane.xlu0 %572  ;;  %v1218_v44 = vmul.f32 %v3097_v13, %v1217_v52  ;;  %v1184_v52 = vsub.f32 1.5, %v1183_v12  ;;  %v1053_v12 = vmul.f32 %v3056_v34, %v1052_v51  ;;  %v3215_v34 = vsel %vm1081_vm11, %v1082_v3, %v1080_v48 }
 0x17f   : > { %v1123_v32 = vmul.f32 0.5, %v1122_v60  ;;  %v1089_v0 = vmul.f32 %v3063_v8, %v1088_v5  ;;  %2195 = vrsqrt.f32 %v3086_v24  ;;  %vm1127_vm11 = vcmp.eq.f32.partialorder %v2997_v43, inf }
 0x180   : > { %v1219_v50 = vmul.f32 0.5, %v1218_v44  ;;  %v1185_v14 = vmul.f32 %v3068_v28, %v1184_v52  ;;  %v1094_v28 = vand.u32 2147483648, %v2978_v16  ;;  %v1054_v3 = vmul.f32 %v1053_v12, %v2967_v22 }
 0x181   : > { %v1124_v60 = vsub.f32 1.5, %v1123_v32  ;;  %v1090_v25 = vmul.f32 %v1089_v0, %v2978_v16 }
 0x182   : > { %920 = vadd.xlane.f32.xlu2 %v919_v10  ;;  %v1220_v44 = vsub.f32 1.5, %v1219_v50  ;;  %v1186_v51 = vmul.f32 %v1185_v14, %v2983_v33 }
 0x183   : > { %v1125_v5 = vmul.f32 %v3090_v36, %v1124_v60  ;;  %v3259_v36 = vsel %vm1153_vm15, %v1154_v56, %v1152_v2  ;;  %v1092_v26 = vsel %vm1091_vm3, %v2978_v16, %v1090_v25  ;;  %v1246_v56 = vmul.f32 %v1245_v40, %v2980_v30 }
 0x184   : > { %v1221_v52 = vmul.f32 %v3097_v13, %v1220_v44  ;;  %v3311_v40 = vsel %vm1093_vm8, %v1094_v28, %v1092_v26  ;;  %v1262_v28 = vand.u32 2147483648, %v3030_v59  ;;  %vm1033_vm15 = vcmp.eq.f32.partialorder %v3004_v47, 0.0 }
 0x185   : > { %v3104_v19 = vpop.xlane.xlu1 %593  ;;  %v3156_v6 = vpop.xlane.xlu2 %560  ;;  %v1126_v12 = vmul.f32 %v1125_v5, %v2997_v43  ;;  %v1248_v2 = vsel %vm1247_vm6, %v2980_v30, %v1246_v56  ;;  %vm971_vm6 = vcmp.eq.f32.partialorder %v3043_v35, inf }
 0x186   : > { %v3128_v10 = vpop.xlane.xlu0 %620  ;;  %v3326_v16 = vsel %vm1249_vm9, %v1250_v17, %v1248_v2 }
 0x18a   : > { %929 = vadd.xlane.f32.xlu2 %v928_v4  ;;  %v3147_v4 = vpop.eup %2187 }
 0x18b   : > { %v1025_v54 = vmul.f32 %v3147_v4, %v3004_v47  ;;  %v3190_v18 = vpop.eup %2189 }
 0x18c   : > { %v1253_v8 = vmul.f32 %v3190_v18, %v3030_v59  ;;  %v3238_v49 = vpop.eup %2191 }
 0x18d   : > { %v3167_v7 = vpop.xlane.xlu1 %602  ;;  %v1026_v15 = vmul.f32 %v3147_v4, %v1025_v54  ;;  %v3236_v27 = vpop.xlane.xlu2 %569  ;;  %v965_v48 = vmul.f32 %v3238_v49, %v3043_v35 }
 0x18e   : > { %v3207_v58 = vpop.xlane.xlu0 %863  ;;  %v1254_v29 = vmul.f32 %v3190_v18, %v1253_v8  ;;  %v3253_v54 = vpop.eup %2193  ;;  %v1034_v8 = vand.u32 2147483648, %v3004_v47 }
 0x18f   : > { %2197 = vrsqrt.f32 %v3207_v58  ;;  %v1027_v42 = vmul.f32 0.5, %v1026_v15  ;;  %v3265_v13 = vpop.eup %2195  ;;  %v1277_v9 = vmul.f32 %v3253_v54, %v3024_v57  ;;  %v1130_v15 = vand.u32 2147483648, %v2997_v43 }
 0x190   : > { %2199 = vrsqrt.f32 %v3066_v62  ;;  %v1255_v0 = vmul.f32 0.5, %v1254_v29  ;;  %v1001_v25 = vmul.f32 %v3265_v13, %v3086_v24  ;;  %vm1367_vm3 = vcmp.eq.f32.partialorder %v3207_v58, inf }
 0x191   : > { %v1028_v14 = vsub.f32 1.5, %v1027_v42  ;;  %2201 = vrsqrt.f32 %v3053_v20 }
 0x192   : > { %938 = vadd.xlane.f32.xlu2 %v937_v23  ;;  %v996_v23 = vsel %vm995_vm12, %v2965_v31, %v994_v61  ;;  %v1226_v31 = vand.u32 2147483648, %v3002_v11  ;;  %vm1129_vm12 = vcmp.eq.f32.partialorder %v2997_v43, 0.0  ;;  %v1222_v61 = vmul.f32 %v1221_v52, %v3002_v11 }
 0x193   : > { %v3245_v50 = vsel %vm997_vm14, %v998_v37, %v996_v23  ;;  %v1056_v37 = vsel %vm1055_vm2, %v2967_v22, %v1054_v3  ;;  %v966_v3 = vmul.f32 %v3238_v49, %v965_v48  ;;  %v1029_v52 = vmul.f32 %v3147_v4, %v1028_v14 }
 0x194   : > { %v3290_v60 = vsel %vm1057_vm5, %v1058_v53, %v1056_v37  ;;  %vm1031_vm14 = vcmp.eq.f32.partialorder %v3004_v47, inf  ;;  %v1224_v5 = vsel %vm1223_vm10, %v3002_v11, %v1222_v61  ;;  %v1256_v42 = vsub.f32 1.5, %v1255_v0 }
 0x195   : > { %v3251_v32 = vpop.xlane.xlu1 %857  ;;  %v2198_v63 = vpop.eup %2197  ;;  %v974_v4 = vand.u32 2147483648, %v3043_v35  ;;  %v967_v48 = vmul.f32 0.5, %v966_v3  ;;  %v1002_v30 = vmul.f32 %v3265_v13, %v1001_v25  ;;  %v1030_v14 = vmul.f32 %v1029_v52, %v3004_v47 }
 0x196   : > { %v1361_v44 = vmul.f32 %v2198_v63, %v3207_v58  ;;  %2203 = vrsqrt.f32 %v3251_v32  ;;  %v3295_v23 = vpop.eup %2199  ;;  %v3322_v29 = vpop.xlane.xlu2 %554  ;;  %vm1259_vm2 = vcmp.eq.f32.partialorder %v3030_v59, inf  ;;  %vm1261_vm5 = vcmp.eq.f32.partialorder %v3030_v59, 0.0 }
 0x197   : > { %v1109_v37 = vmul.f32 %v3295_v23, %v3066_v62  ;;  %v3332_v26 = vpop.eup %2201  ;;  %2205 = vrsqrt.f32 %v3128_v10  ;;  %v968_v3 = vsub.f32 1.5, %v967_v48  ;;  %v1003_v25 = vmul.f32 0.5, %v1002_v30 }
 0x198   : > { %v1362_v22 = vmul.f32 %v2198_v63, %v1361_v44  ;;  %2207 = vrsqrt.f32 %v3322_v29  ;;  %v1032_v52 = vsel %vm1031_vm14, %v3004_v47, %v1030_v14  ;;  %vm1343_vm8 = vcmp.eq.f32.partialorder %v3251_v32, inf }
 0x199   : > { %v1110_v11 = vmul.f32 %v3295_v23, %v1109_v37  ;;  %v1004_v14 = vsub.f32 1.5, %v1003_v25  ;;  %vm1345_vm9 = vcmp.eq.f32.partialorder %v3251_v32, 0.0  ;;  %vm1009_vm10 = vcmp.eq.f32.partialorder %v3086_v24, 0.0 }
 0x19a   : > { %941 = vadd.xlane.f32.xlu2 %v3132_v21  ;;  %v1188_v21 = vsel %vm1187_vm4, %v2983_v33, %v1186_v51  ;;  %v1128_v51 = vsel %vm1127_vm11, %v2997_v43, %v1126_v12  ;;  %v1278_v33 = vmul.f32 %v3253_v54, %v1277_v9  ;;  %v3344_v12 = vsel %vm1225_vm13, %v1226_v31, %v1224_v5  ;;  %v3349_v43 = vpop.xlane.xlu0 %872 }
 0x19b   : > { %v3307_v53 = vsel %vm1189_vm7, %v1190_v1, %v1188_v21  ;;  %v1363_v1 = vmul.f32 0.5, %v1362_v22  ;;  %v3336_v56 = vsel %vm1129_vm12, %v1130_v15, %v1128_v51  ;;  %v1257_v9 = vmul.f32 %v3190_v18, %v1256_v42 }
 0x19c   : > { %v2204_v61 = vpop.eup %2203  ;;  %v1279_v44 = vmul.f32 0.5, %v1278_v33  ;;  %v1157_v31 = vmul.f32 %v3332_v26, %v3053_v20  ;;  %vm1369_vm4 = vcmp.eq.f32.partialorder %v3207_v58, 0.0  ;;  %v3372_v37 = vmul.f32 0.5, %v1110_v11 }
 0x19d   : > { %v1364_v17 = vsub.f32 1.5, %v1363_v1  ;;  %v3340_v21 = vpop.xlane.xlu1 %869  ;;  %v1337_v2 = vmul.f32 %v2204_v61, %v3251_v32  ;;  %v3369_v33 = vpop.eup %2205  ;;  %v1258_v1 = vmul.f32 %v1257_v9, %v3030_v59  ;;  %v3385_v9 = vsel %vm1033_vm15, %v1034_v8, %v1032_v52 }
 0x19e   : > { %2209 = vrsqrt.f32 %v3340_v21  ;;  %v1280_v5 = vsub.f32 1.5, %v1279_v44  ;;  %v1010_v11 = vand.u32 2147483648, %v3086_v24  ;;  %v1112_v8 = vsub.f32 1.5, %v3372_v37 }
 0x19f   : > { %v1365_v15 = vmul.f32 %v2198_v63, %v1364_v17  ;;  %2211 = vrsqrt.f32 %v3349_v43  ;;  %v1370_v63 = vand.u32 2147483648, %v3207_v58  ;;  %v1338_v51 = vmul.f32 %v2204_v61, %v1337_v2  ;;  %v3374_v17 = vpop.eup %2207 }
 0x1a0   : > { %v1158_v2 = vmul.f32 %v3332_v26, %v1157_v31  ;;  %2213 = vrsqrt.f32 %v3104_v19  ;;  %v1260_v47 = vsel %vm1259_vm2, %v3030_v59, %v1258_v1  ;;  %v1037_v52 = vmul.f32 %v3374_v17, %v3322_v29 }
 0x1a1   : > { %v1366_v22 = vmul.f32 %v1365_v15, %v3207_v58  ;;  %v1339_v30 = vmul.f32 0.5, %v1338_v51  ;;  %v969_v15 = vmul.f32 %v3238_v49, %v968_v3  ;;  %vm1007_vm7 = vcmp.eq.f32.partialorder %v3086_v24, inf }
 0x1a2   : > { %v1301_v1 = vmul.f32 %v3369_v33, %v3128_v10  ;;  %v3412_v37 = vpop.xlane.xlu0 %881  ;;  %2215 = vrsqrt.f32 %v3156_v6  ;;  %vm973_vm11 = vcmp.eq.f32.partialorder %v3043_v35, 0.0  ;;  %vm1393_vm12 = vcmp.eq.f32.partialorder %v3340_v21, 0.0 }
 0x1a3   : > { %v1368_v42 = vsel %vm1367_vm3, %v3207_v58, %v1366_v22  ;;  %v3379_v22 = vpop.xlane.xlu2 %578  ;;  %v1340_v3 = vsub.f32 1.5, %v1339_v30  ;;  %2217 = vrsqrt.f32 %v3167_v7  ;;  %vm1403_vm13 = vcmp.eq.f32.partialorder %v3349_v43, inf }
 0x1a4   : > { %v1371_v48 = vsel %vm1369_vm4, %v1370_v63, %v1368_v42  ;;  %v2210_v58 = vpop.eup %2209  ;;  %v970_v42 = vmul.f32 %v969_v15, %v3043_v35  ;;  %2219 = vrsqrt.f32 %v3412_v37  ;;  %vm1163_vm14 = vcmp.eq.f32.partialorder %v3053_v20, inf }
 0x1a5   : > { %v1722_v44 = vsub.f32 %v3173_v46, %v1371_v48  ;;  %v3390_v31 = vpop.eup %2211  ;;  %v1281_v46 = vmul.f32 %v3253_v54, %v1280_v5  ;;  %v1385_v63 = vmul.f32 %v2210_v58, %v3340_v21  ;;  %v1341_v51 = vmul.f32 %v2204_v61, %v1340_v3  ;;  %v3430_v49 = vpop.xlane.xlu1 %878 }
 0x1a6   : > { %v3403_v54 = vmul.f32 0.5, %v1158_v2  ;;  %v1005_v5 = vmul.f32 %v3265_v13, %v1004_v14  ;;  %v1397_v30 = vmul.f32 %v3390_v31, %v3349_v43  ;;  %v1346_v13 = vand.u32 2147483648, %v3251_v32 }
 0x1a7   : > { %v1754_v25 = vadd.f32 1.0, %v1722_v44  ;;  %v1342_v61 = vmul.f32 %v1341_v51, %v3251_v32  ;;  %v1386_v44 = vmul.f32 %v2210_v58, %v1385_v63  ;;  %v1038_v2 = vmul.f32 %v3374_v17, %v1037_v52 }
 0x1a8   : > { %v855_v3 = vsel %vm323_vm0, 0.0, %v854_v39  ;;  %v1006_v63 = vmul.f32 %v1005_v5, %v3086_v24  ;;  %v3439_v39 = vsel %vm1261_vm5, %v1262_v28, %v1260_v47  ;;  %v3442_v5 = vmul.f32 %v1281_v46, %v3024_v57 }
 0x1a9   : > { %v1786_v48 = vmax.f32 %v1754_v25, 0.0  ;;  %v1344_v15 = vsel %vm1343_vm8, %v3251_v32, %v1342_v61  ;;  %v1387_v14 = vmul.f32 0.5, %v1386_v44  ;;  %v3424_v25 = vpop.eup %2213  ;;  %v1398_v32 = vmul.f32 %v3390_v31, %v1397_v30 }
 0x1aa   : > { %v1347_v51 = vsel %vm1345_vm9, %v1346_v13, %v1344_v15  ;;  %4203 = vst [vmem:[#allocation13_spill] sm:$0xff] %v3442_v5  ;;  %v1302_v61 = vmul.f32 %v3369_v33, %v1301_v1  ;;  %2221 = vrsqrt.f32 %v3236_v27  ;;  %v1039_v44 = vmul.f32 0.5, %v1038_v2  ;;  %v3449_v15 = vpop.eup %2215 }
 0x1ab   : > { %1852 = vst [vmem:[#allocation1 + $0x2] ss:$4 sm:$0xff] %v1786_v48  ;;  %v949_v48 = vsel %vm531_vm1, %v855_v3, 0.0  ;;  %v1720_v52 = vsub.f32 %v3196_v45, %v1347_v51  ;;  %v1388_v38 = vsub.f32 1.5, %v1387_v14  ;;  %v3446_v30 = vpop.xlane.xlu2 %548  ;;  %2223 = vrsqrt.f32 %v3430_v49  ;;  %v3463_v3 = vpop.eup %2217 }
 0x1ac   : > { %950 = vadd.xlane.f32.xlu2 %v949_v48  ;;  %v972_v59 = vsel %vm971_vm6, %v3043_v35, %v970_v42  ;;  %v1113_v28 = vmul.f32 %v3295_v23, %v1112_v8  ;;  %vm1115_vm0 = vcmp.eq.f32.partialorder %v3066_v62, inf  ;;  %v1160_v46 = vsub.f32 1.5, %v3403_v54  ;;  %v3468_v8 = vpop.eup %2219  ;;  %v3473_v48 = vpop.xlane.xlu0 %890 }
 0x1ad   : > { %v1752_v45 = vadd.f32 1.0, %v1720_v52  ;;  %v1389_v13 = vmul.f32 %v2210_v58, %v1388_v38  ;;  %v1193_v47 = vmul.f32 %v3424_v25, %v3104_v19  ;;  %v1008_v58 = vsel %vm1007_vm7, %v3086_v24, %v1006_v63 }
 0x1ae   : > { %v1399_v1 = vmul.f32 0.5, %v1398_v32  ;;  %v1303_v42 = vmul.f32 0.5, %v1302_v61  ;;  %vm1391_vm1 = vcmp.eq.f32.partialorder %v3340_v21, inf  ;;  %v1394_v23 = vand.u32 2147483648, %v3340_v21 }
 0x1af   : > { %v1784_v2 = vmax.f32 %v1752_v45, 0.0  ;;  %v1390_v14 = vmul.f32 %v1389_v13, %v3340_v21  ;;  %2225 = vrsqrt.f32 %v3446_v30  ;;  %v1040_v51 = vsub.f32 1.5, %v1039_v44 }
 0x1b0   : > { %v3475_v32 = vpop.eup %2221  ;;  %v1011_v52 = vsel %vm1009_vm10, %v1010_v11, %v1008_v58  ;;  %v1194_v38 = vmul.f32 %v3424_v25, %v1193_v47  ;;  %v1061_v61 = vmul.f32 %v3449_v15, %v3156_v6  ;;  %v1114_v13 = vmul.f32 %v1113_v28, %v3066_v62 }
 0x1b1   : > { %1848 = vst [vmem:[#allocation1] ss:$4 sm:$0xff] %v1784_v2  ;;  %v1392_v63 = vsel %vm1391_vm1, %v3340_v21, %v1390_v14  ;;  %v2224_v44 = vpop.eup %2223  ;;  %v3488_v21 = vsel %vm973_vm11, %v974_v4, %v972_v59  ;;  %v1400_v2 = vsub.f32 1.5, %v1399_v1  ;;  %v1161_v24 = vmul.f32 %v3332_v26, %v1160_v46 }
 0x1b2   : > { %v1395_v45 = vsel %vm1393_vm12, %v1394_v23, %v1392_v63  ;;  %v1304_v11 = vsub.f32 1.5, %v1303_v42  ;;  %v1433_v47 = vmul.f32 %v3468_v8, %v3412_v37  ;;  %v1421_v58 = vmul.f32 %v2224_v44, %v3430_v49 }
 0x1b3   : > { %v1724_v14 = vsub.f32 %v1011_v52, %v1395_v45  ;;  %v1229_v23 = vmul.f32 %v3463_v3, %v3167_v7  ;;  %v1041_v63 = vmul.f32 %v3374_v17, %v1040_v51  ;;  %2227 = vrsqrt.f32 %v3473_v48  ;;  %v3504_v1 = vpop.xlane.xlu2 %596 }
 0x1b4   : > { %v3499_v59 = vmul.f32 0.5, %v1194_v38  ;;  %v1062_v28 = vmul.f32 %v3449_v15, %v1061_v61  ;;  %v1097_v26 = vmul.f32 %v3475_v32, %v3236_v27  ;;  %v1422_v46 = vmul.f32 %v2224_v44, %v1421_v58 }
 0x1b5   : > { %v1756_v35 = vadd.f32 1.0, %v1724_v14  ;;  %v2226_v4 = vpop.eup %2225  ;;  %v3509_v42 = vsel %vm1115_vm0, %v3066_v62, %v1114_v13  ;;  %v1401_v17 = vmul.f32 %v3390_v31, %v1400_v2  ;;  %v3514_v38 = vmul.f32 %v1161_v24, %v3053_v20 }
 0x1b6   : > { %v1013_v52 = vmul.f32 %v2226_v4, %v3446_v30  ;;  %v1434_v61 = vmul.f32 %v3468_v8, %v1433_v47  ;;  %2229 = vrsqrt.f32 %v3379_v22  ;;  %v1423_v45 = vmul.f32 0.5, %v1422_v46 }
 0x1b7   : > { %v1788_v51 = vmax.f32 %v1756_v35, 0.0  ;;  %v3519_v14 = vmul.f32 %v3369_v33, %v1304_v11  ;;  %v1230_v58 = vmul.f32 %v3463_v3, %v1229_v23  ;;  %v1042_v13 = vmul.f32 %v1041_v63, %v3322_v29  ;;  %v3532_v23 = vpop.xlane.xlu0 %899 }
 0x1b8   : > { %v1014_v31 = vmul.f32 %v2226_v4, %v1013_v52  ;;  %v1196_v2 = vsub.f32 1.5, %v3499_v59  ;;  %v3524_v35 = vmul.f32 0.5, %v1062_v28  ;;  %v1098_v24 = vmul.f32 %v3475_v32, %v1097_v26  ;;  %v3537_v28 = vpop.xlane.xlu1 %887 }
 0x1b9   : > { %1856 = vst [vmem:[#allocation1 + $0x20] ss:$4 sm:$0xff] %v1788_v51  ;;  %v1424_v54 = vsub.f32 1.5, %v1423_v45  ;;  %v3527_v47 = vpop.eup %2227  ;;  %v1402_v46 = vmul.f32 %v1401_v17, %v3349_v43  ;;  %v1406_v33 = vand.u32 2147483648, %v3349_v43  ;;  %vm1043_vm15 = vcmp.eq.f32.partialorder %v3322_v29, inf }
 0x1ba   : > { %v1015_v11 = vmul.f32 0.5, %v1014_v31  ;;  %vm1045_vm2 = vcmp.eq.f32.partialorder %v3322_v29, 0.0  ;;  %v1435_v63 = vmul.f32 0.5, %v1434_v61  ;;  %v3539_v26 = vmul.f32 0.5, %v1230_v58 }
 0x1bb   : > { %v1425_v59 = vmul.f32 %v2224_v44, %v1424_v54  ;;  %v1044_v17 = vsel %vm1043_vm15, %v3322_v29, %v1042_v13  ;;  %v1046_v51 = vand.u32 2147483648, %v3322_v29  ;;  %vm1117_vm3 = vcmp.eq.f32.partialorder %v3066_v62, 0.0 }
 0x1bc   : > { %v1016_v52 = vsub.f32 1.5, %v1015_v11  ;;  %v3543_v45 = vpop.eup %2229  ;;  %v1099_v31 = vmul.f32 0.5, %v1098_v24  ;;  %v1469_v18 = vmul.f32 %v3527_v47, %v3473_v48  ;;  %2231 = vrsqrt.f32 %v3532_v23 }
 0x1bd   : > { %v1426_v61 = vmul.f32 %v1425_v59, %v3430_v49  ;;  %vm1165_vm4 = vcmp.eq.f32.partialorder %v3053_v20, 0.0  ;;  %v1404_v54 = vsel %vm1403_vm13, %v3349_v43, %v1402_v46  ;;  %vm1427_vm5 = vcmp.eq.f32.partialorder %v3430_v49, inf  ;;  %v3560_v59 = vpop.xlane.xlu2 %617 }
 0x1be   : > { %v1430_v44 = vand.u32 2147483648, %v3430_v49  ;;  %v1017_v58 = vmul.f32 %v2226_v4, %v1016_v52  ;;  %v1047_v13 = vsel %vm1045_vm2, %v1046_v51, %v1044_v17  ;;  %v1436_v24 = vsub.f32 1.5, %v1435_v63 }
 0x1bf   : > { %v1428_v11 = vsel %vm1427_vm5, %v3430_v49, %v1426_v61  ;;  %vm1429_vm6 = vcmp.eq.f32.partialorder %v3430_v49, 0.0  ;;  %v1133_v0 = vmul.f32 %v3543_v45, %v3379_v22  ;;  %vm1019_vm7 = vcmp.eq.f32.partialorder %v3446_v30, inf }
 0x1c0   : > { %v1431_v5 = vsel %vm1429_vm6, %v1430_v44, %v1428_v11  ;;  %v1018_v46 = vmul.f32 %v1017_v58, %v3446_v30  ;;  %v1470_v4 = vmul.f32 %v3527_v47, %v1469_v18  ;;  %v1022_v29 = vand.u32 2147483648, %v3446_v30 }
 0x1c1   : > { %v1727_v52 = vsub.f32 %v1047_v13, %v1431_v5  ;;  %2233 = vrsqrt.f32 %v3537_v28  ;;  %vm1307_vm8 = vcmp.eq.f32.partialorder %v3128_v10, inf  ;;  %v1197_v49 = vmul.f32 %v3424_v25, %v1196_v2 }
 0x1c2   : > { %vm1199_vm9 = vcmp.eq.f32.partialorder %v3104_v19, inf  ;;  %vm1405_vm10 = vcmp.eq.f32.partialorder %v3349_v43, 0.0  ;;  %v1020_v63 = vsel %vm1019_vm7, %v3446_v30, %v1018_v46  ;;  %vm1021_vm11 = vcmp.eq.f32.partialorder %v3446_v30, 0.0  ;;  %v3575_v17 = vpop.eup %2231  ;;  %v3585_v46 = vpop.xlane.xlu1 %896 }
 0x1c3   : > { %v1064_v18 = vsub.f32 1.5, %v3524_v35  ;;  %v1407_v5 = vsel %vm1405_vm10, %v1406_v33, %v1404_v54  ;;  %v1759_v51 = vadd.f32 1.0, %v1727_v52  ;;  %v1023_v61 = vsel %vm1021_vm11, %v1022_v29, %v1020_v63 }
 0x1c4   : > { %v1164_v25 = vsel %vm1163_vm14, %v3053_v20, %v3514_v38  ;;  %v1232_v2 = vsub.f32 1.5, %v3539_v26  ;;  %v1100_v44 = vsub.f32 1.5, %v1099_v31  ;;  %v1725_v43 = vsub.f32 %v1023_v61, %v1407_v5 }
 0x1c5   : > { %v1437_v58 = vmul.f32 %v3468_v8, %v1436_v24  ;;  %v1134_v30 = vmul.f32 %v3543_v45, %v1133_v0  ;;  %v1471_v13 = vmul.f32 0.5, %v1470_v4  ;;  %v1791_v11 = vmax.f32 %v1759_v51, 0.0  ;;  %v3598_v0 = vpop.xlane.xlu0 %908 }
 0x1c6   : > { %v4204_v35 = vand.u32 2147483648, %v3066_v62  ;;  %vm1309_vm0 = vcmp.eq.f32.partialorder %v3128_v10, 0.0  ;;  %v1070_v38 = vand.u32 2147483648, %v3156_v6  ;;  %v1757_v26 = vadd.f32 1.0, %v1725_v43 }
 0x1c7   : > { %v1505_v8 = vmul.f32 %v3575_v17, %v3532_v23  ;;  %v3600_v31 = vpop.eup %2233  ;;  %v4205_v54 = vand.u32 2147483648, %v3053_v20  ;;  %v1306_v62 = vmul.f32 %v3519_v14, %v3128_v10  ;;  %vm1201_vm1 = vcmp.eq.f32.partialorder %v3104_v19, 0.0  ;;  %1862 = vst [vmem:[#allocation1 + $0x23] ss:$4 sm:$0xff] %v1791_v11 }
 0x1c8   : > { %v3592_v33 = vsel %vm1117_vm3, %v4204_v35, %v3509_v42  ;;  %v1198_v42 = vmul.f32 %v1197_v49, %v3104_v19  ;;  %v1065_v4 = vmul.f32 %v3449_v15, %v1064_v18  ;;  %vm1067_vm12 = vcmp.eq.f32.partialorder %v3156_v6, inf  ;;  %v3619_v49 = vpop.xlane.xlu2 %860 }
 0x1c9   : > { %v3606_v24 = vsel %vm1165_vm4, %v4205_v54, %v1164_v25  ;;  %v1233_v52 = vmul.f32 %v3463_v3, %v1232_v2  ;;  %v1101_v29 = vmul.f32 %v3475_v32, %v1100_v44  ;;  %v1789_v63 = vmax.f32 %v1757_v26, 0.0 }
 0x1ca   : > { %2235 = vrsqrt.f32 %v3504_v1  ;;  %v1438_v20 = vmul.f32 %v1437_v58, %v3412_v37  ;;  %v1135_v5 = vmul.f32 0.5, %v1134_v30  ;;  %v1472_v14 = vsub.f32 1.5, %v1471_v13 }
 0x1cb   : > { %2237 = vrsqrt.f32 %v3598_v0  ;;  %vm1069_vm13 = vcmp.eq.f32.partialorder %v3156_v6, 0.0  ;;  %vm1439_vm14 = vcmp.eq.f32.partialorder %v3412_v37, inf  ;;  %1858 = vst [vmem:[#allocation1 + $0x21] ss:$4 sm:$0xff] %v1789_v63  ;;  %v1506_v15 = vmul.f32 %v3575_v17, %v1505_v8 }
 0x1cc   : > { %v1457_v3 = vmul.f32 %v3600_v31, %v3537_v28  ;;  %2239 = vrsqrt.f32 %v3585_v46  ;;  %v1308_v32 = vsel %vm1307_vm8, %v3128_v10, %v1306_v62  ;;  %v1200_v18 = vsel %vm1199_vm9, %v3104_v19, %v1198_v42  ;;  %v3658_v62 = vpop.xlane.xlu1 %905 }
 0x1cd   : > { %vm1235_vm15 = vcmp.eq.f32.partialorder %v3167_v7, inf  ;;  %vm1237_vm2 = vcmp.eq.f32.partialorder %v3167_v7, 0.0  ;;  %v1066_v51 = vmul.f32 %v1065_v4, %v3156_v6  ;;  %v1234_v61 = vmul.f32 %v1233_v52, %v3167_v7 }
 0x1ce   : > { %vm1441_vm3 = vcmp.eq.f32.partialorder %v3412_v37, 0.0  ;;  %v1442_v25 = vand.u32 2147483648, %v3412_v37  ;;  %v1102_v2 = vmul.f32 %v1101_v29, %v3236_v27  ;;  %v1440_v44 = vsel %vm1439_vm14, %v3412_v37, %v1438_v20 }
 0x1cf   : > { %v1136_v43 = vsub.f32 1.5, %v1135_v5  ;;  %v1473_v58 = vmul.f32 %v3527_v47, %v1472_v14  ;;  %v1238_v13 = vand.u32 2147483648, %v3167_v7  ;;  %v1507_v11 = vmul.f32 0.5, %v1506_v15  ;;  %v3681_v15 = vpop.xlane.xlu0 %917 }
 0x1d0   : > { %v3642_v30 = vpop.eup %2235  ;;  %v1458_v35 = vmul.f32 %v3600_v31, %v1457_v3  ;;  %2241 = vrsqrt.f32 %v3619_v49  ;;  %v4206_v8 = vand.u32 2147483648, %v3128_v10  ;;  %vm1103_vm4 = vcmp.eq.f32.partialorder %v3236_v27, inf }
 0x1d1   : > { %v3647_v26 = vpop.eup %2237  ;;  %vm1105_vm5 = vcmp.eq.f32.partialorder %v3236_v27, 0.0  ;;  %v1106_v47 = vand.u32 2147483648, %v3236_v27  ;;  %v4207_v4 = vand.u32 2147483648, %v3104_v19  ;;  %v1068_v10 = vsel %vm1067_vm12, %v3156_v6, %v1066_v51 }
 0x1d2   : > { %v3653_v54 = vsel %vm1309_vm0, %v4206_v8, %v1308_v32  ;;  %v3660_v42 = vpop.eup %2239  ;;  %v1236_v29 = vsel %vm1235_vm15, %v3167_v7, %v1234_v61  ;;  %v1443_v63 = vsel %vm1441_vm3, %v1442_v25, %v1440_v44  ;;  %v1104_v20 = vsel %vm1103_vm4, %v3236_v27, %v1102_v2  ;;  %v3699_v25 = vpop.xlane.xlu2 %866 }
 0x1d3   : > { %v3666_v52 = vsel %vm1201_vm1, %v4207_v4, %v1200_v18  ;;  %v1137_v5 = vmul.f32 %v3543_v45, %v1136_v43  ;;  %v1474_v14 = vmul.f32 %v1473_v58, %v3473_v48  ;;  %v1205_v19 = vmul.f32 %v3642_v30, %v3504_v1 }
 0x1d4   : > { %vm1475_vm6 = vcmp.eq.f32.partialorder %v3473_v48, inf  ;;  %v1508_v3 = vsub.f32 1.5, %v1507_v11  ;;  %v1459_v32 = vmul.f32 0.5, %v1458_v35  ;;  %v1541_v18 = vmul.f32 %v3647_v26, %v3598_v0 }
 0x1d5   : > { %v3690_v37 = vsel %vm1069_vm13, %v1070_v38, %v1068_v10  ;;  %v3694_v45 = vsel %vm1237_vm2, %v1238_v13, %v1236_v29  ;;  %v1728_v51 = vsub.f32 %v3290_v60, %v1443_v63  ;;  %v1493_v61 = vmul.f32 %v3660_v42, %v3585_v46  ;;  %v3727_v29 = vpop.xlane.xlu1 %914 }
 0x1d6   : > { %v2242_v2 = vpop.eup %2241  ;;  %v3703_v44 = vsel %vm1105_vm5, %v1106_v47, %v1104_v20  ;;  %vm1477_vm7 = vcmp.eq.f32.partialorder %v3473_v48, 0.0  ;;  %v1478_v6 = vand.u32 2147483648, %v3473_v48  ;;  %2243 = vrsqrt.f32 %v3681_v15 }
 0x1d7   : > { %v1138_v7 = vmul.f32 %v1137_v5, %v3379_v22  ;;  %v1476_v60 = vsel %vm1475_vm6, %v3473_v48, %v1474_v14  ;;  %v1206_v38 = vmul.f32 %v3642_v30, %v1205_v19  ;;  %v1349_v43 = vmul.f32 %v2242_v2, %v3619_v49 }
 0x1d8   : > { %v1509_v58 = vmul.f32 %v3575_v17, %v1508_v3  ;;  %v1460_v13 = vsub.f32 1.5, %v1459_v32  ;;  %v1542_v27 = vmul.f32 %v3647_v26, %v1541_v18  ;;  %2245 = vrsqrt.f32 %v3699_v25 }
 0x1d9   : > { %v3715_v11 = vadd.f32 1.0, %v1728_v51  ;;  %v1494_v35 = vmul.f32 %v3660_v42, %v1493_v61  ;;  %2247 = vrsqrt.f32 %v3658_v62  ;;  %v1350_v8 = vmul.f32 %v2242_v2, %v1349_v43  ;;  %v3735_v51 = vpop.xlane.xlu0 %926 }
 0x1da   : > { %vm1139_vm8 = vcmp.eq.f32.partialorder %v3379_v22, inf  ;;  %vm1141_vm9 = vcmp.eq.f32.partialorder %v3379_v22, 0.0  ;;  %v1142_v47 = vand.u32 2147483648, %v3379_v22  ;;  %vm1511_vm10 = vcmp.eq.f32.partialorder %v3532_v23, inf }
 0x1db   : > { %v1140_v17 = vsel %vm1139_vm8, %v3379_v22, %v1138_v7  ;;  %v1479_v4 = vsel %vm1477_vm7, %v1478_v6, %v1476_v60  ;;  %vm1513_vm11 = vcmp.eq.f32.partialorder %v3532_v23, 0.0  ;;  %v1351_v10 = vmul.f32 0.5, %v1350_v8 }
 0x1dc   : > { %v3729_v63 = vpop.eup %2243  ;;  %v1510_v20 = vmul.f32 %v1509_v58, %v3532_v23  ;;  %v1461_v5 = vmul.f32 %v3600_v31, %v1460_v13  ;;  %v1207_v14 = vmul.f32 0.5, %v1206_v38  ;;  %v1543_v19 = vmul.f32 0.5, %v1542_v27 }
 0x1dd   : > { %v1792_v3 = vmax.f32 %v3715_v11, 0.0  ;;  %v1514_v32 = vand.u32 2147483648, %v3532_v23  ;;  %v1495_v18 = vmul.f32 0.5, %v1494_v35  ;;  %v1352_v48 = vsub.f32 1.5, %v1351_v10 }
 0x1de   : > { %v2246_v61 = vpop.eup %2245  ;;  %v3739_v6 = vsel %vm1141_vm9, %v1142_v47, %v1140_v17  ;;  %vm1463_vm0 = vcmp.eq.f32.partialorder %v3537_v28, inf  ;;  %vm1465_vm1 = vcmp.eq.f32.partialorder %v3537_v28, 0.0  ;;  %v1466_v31 = vand.u32 2147483648, %v3537_v28 }
 0x1df   : > { %v3744_v7 = vpop.eup %2247  ;;  %v1731_v60 = vsub.f32 %v3311_v40, %v1479_v4  ;;  %v1577_v38 = vmul.f32 %v3729_v63, %v3681_v15  ;;  %v1353_v43 = vmul.f32 %v2242_v2, %v1352_v48  ;;  %v1373_v58 = vmul.f32 %v2246_v61, %v3699_v25 }
 0x1e0   : > { %v1512_v22 = vsel %vm1511_vm10, %v3532_v23, %v1510_v20  ;;  %v1462_v13 = vmul.f32 %v1461_v5, %v3537_v28  ;;  %v1208_v27 = vsub.f32 1.5, %v1207_v14  ;;  %v1544_v35 = vsub.f32 1.5, %v1543_v19 }
 0x1e1   : > { %v1496_v8 = vsub.f32 1.5, %v1495_v18  ;;  %v1354_v47 = vmul.f32 %v1353_v43, %v3619_v49  ;;  %vm1355_vm12 = vcmp.eq.f32.partialorder %v3619_v49, inf  ;;  %v1374_v40 = vmul.f32 %v2246_v61, %v1373_v58  ;;  %v3773_v58 = vpop.xlane.xlu1 %923 }
 0x1e2   : > { %v1529_v17 = vmul.f32 %v3744_v7, %v3658_v62  ;;  %vm1357_vm13 = vcmp.eq.f32.partialorder %v3619_v49, 0.0  ;;  %v1358_v2 = vand.u32 2147483648, %v3619_v49  ;;  %2249 = vrsqrt.f32 %v3727_v29 }
 0x1e3   : > { %v1578_v4 = vmul.f32 %v3729_v63, %v1577_v38  ;;  %v1356_v10 = vsel %vm1355_vm12, %v3619_v49, %v1354_v47  ;;  %2251 = vrsqrt.f32 %v3735_v51  ;;  %v1375_v20 = vmul.f32 0.5, %v1374_v40 }
 0x1e4   : > { %v1515_v5 = vsel %vm1513_vm11, %v1514_v32, %v1512_v22  ;;  %v1214_v14 = vand.u32 2147483648, %v3504_v1  ;;  %v1545_v19 = vmul.f32 %v3647_v26, %v1544_v35  ;;  %v1359_v18 = vsel %vm1357_vm13, %v1358_v2, %v1356_v10  ;;  %v3780_v26 = vpop.xlane.xlu2 %875 }
 0x1e5   : > { %v1464_v48 = vsel %vm1463_vm0, %v3537_v28, %v1462_v13  ;;  %v1497_v43 = vmul.f32 %v3660_v42, %v1496_v8  ;;  %v1721_v38 = vsub.f32 %v3488_v21, %v1359_v18  ;;  %v1376_v49 = vsub.f32 1.5, %v1375_v20  ;;  %v3784_v13 = vpop.xlane.xlu0 %935 }
 0x1e6   : > { %v3775_v47 = vadd.f32 1.0, %v1731_v60  ;;  %vm1547_vm14 = vcmp.eq.f32.partialorder %v3598_v0, inf  ;;  %vm1499_vm15 = vcmp.eq.f32.partialorder %v3585_v46, inf  ;;  %v1530_v23 = vmul.f32 %v3744_v7, %v1529_v17 }
 0x1e7   : > { %v1209_v32 = vmul.f32 %v3642_v30, %v1208_v27  ;;  %vm1211_vm2 = vcmp.eq.f32.partialorder %v3504_v1, inf  ;;  %v1579_v42 = vmul.f32 0.5, %v1578_v4  ;;  %v1753_v22 = vadd.f32 1.0, %v1721_v38 }
 0x1e8   : > { %v1377_v21 = vmul.f32 %v2246_v61, %v1376_v49  ;;  %v3786_v35 = vpop.eup %2249  ;;  %v1734_v60 = vsub.f32 %v3336_v56, %v1515_v5  ;;  %v1467_v8 = vsel %vm1465_vm1, %v1466_v31, %v1464_v48  ;;  %v1546_v40 = vmul.f32 %v1545_v19, %v3598_v0 }
 0x1e9   : > { %2253 = vrsqrt.f32 %v3560_v59  ;;  %v3793_v17 = vpop.eup %2251  ;;  %v1498_v30 = vmul.f32 %v1497_v43, %v3585_v46  ;;  %v1785_v27 = vmax.f32 %v1753_v22, 0.0  ;;  %vm1379_vm3 = vcmp.eq.f32.partialorder %v3699_v25, inf  ;;  %v3827_v22 = vpop.xlane.xlu1 %932 }
 0x1ea   : > { %v1378_v61 = vmul.f32 %v1377_v21, %v3699_v25  ;;  %v1531_v2 = vmul.f32 0.5, %v1530_v23  ;;  %vm1381_vm4 = vcmp.eq.f32.partialorder %v3699_v25, 0.0  ;;  %v1382_v56 = vand.u32 2147483648, %v3699_v25 }
 0x1eb   : > { %2255 = vrsqrt.f32 %v3784_v13  ;;  %vm1213_vm5 = vcmp.eq.f32.partialorder %v3504_v1, 0.0  ;;  %v1580_v28 = vsub.f32 1.5, %v1579_v42  ;;  %1850 = vst [vmem:[#allocation1 + $0x1] ss:$4 sm:$0xff] %v1785_v27  ;;  %v1565_v31 = vmul.f32 %v3786_v35, %v3727_v29 }
 0x1ec   : > { %v1380_v4 = vsel %vm1379_vm3, %v3699_v25, %v1378_v61  ;;  %2257 = vrsqrt.f32 %v3780_v26  ;;  %v3806_v10 = vadd.f32 1.0, %v1734_v60  ;;  %v1210_v20 = vmul.f32 %v1209_v32, %v3504_v1 }
 0x1ed   : > { %v1613_v5 = vmul.f32 %v3793_v17, %v3735_v51  ;;  %v1383_v19 = vsel %vm1381_vm4, %v1382_v56, %v1380_v4  ;;  %v1730_v18 = vsub.f32 %v3215_v34, %v1467_v8  ;;  %vm1549_vm6 = vcmp.eq.f32.partialorder %v3598_v0, 0.0 }
 0x1ee   : > { %v1550_v48 = vand.u32 2147483648, %v3598_v0  ;;  %v1723_v43 = vsub.f32 %v3245_v50, %v1383_v19  ;;  %v1548_v25 = vsel %vm1547_vm14, %v3598_v0, %v1546_v40  ;;  %vm1501_vm7 = vcmp.eq.f32.partialorder %v3585_v46, 0.0 }
 0x1ef   : > { %v3815_v38 = vpop.eup %2253  ;;  %v1502_v49 = vand.u32 2147483648, %v3585_v46  ;;  %v1532_v23 = vsub.f32 1.5, %v1531_v2  ;;  %v1500_v34 = vsel %vm1499_vm15, %v3585_v46, %v1498_v30  ;;  %v1581_v32 = vmul.f32 %v3729_v63, %v1580_v28  ;;  %v3837_v30 = vpop.xlane.xlu2 %884 }
 0x1f0   : > { %v1566_v42 = vmul.f32 %v3786_v35, %v1565_v31  ;;  %v1755_v50 = vadd.f32 1.0, %v1723_v43  ;;  %v1795_v60 = vmax.f32 %v3775_v47, 0.0  ;;  %v1798_v8 = vmax.f32 %v3806_v10, 0.0 }
 0x1f1   : > { %v3829_v21 = vpop.eup %2255  ;;  %v1212_v40 = vsel %vm1211_vm2, %v3504_v1, %v1210_v20  ;;  %v1614_v27 = vmul.f32 %v3793_v17, %v1613_v5  ;;  %v1762_v61 = vadd.f32 1.0, %v1730_v18  ;;  %v1551_v2 = vsel %vm1549_vm6, %v1550_v48, %v1548_v25 }
 0x1f2   : > { %v2258_v63 = vpop.eup %2257  ;;  %v1289_v56 = vmul.f32 %v3815_v38, %v3560_v59  ;;  %v1787_v28 = vmax.f32 %v1755_v50, 0.0  ;;  %v1503_v47 = vsel %vm1501_vm7, %v1502_v49, %v1500_v34  ;;  %v1533_v31 = vmul.f32 %v3744_v7, %v1532_v23 }
 0x1f3   : > { %2259 = vrsqrt.f32 %v3773_v58  ;;  %v1409_v4 = vmul.f32 %v2258_v63, %v3780_v26  ;;  %v1582_v20 = vmul.f32 %v1581_v32, %v3681_v15  ;;  %v1567_v5 = vmul.f32 0.5, %v1566_v42 }
 0x1f4   : > { %1854 = vst [vmem:[#allocation1 + $0x3] ss:$4 sm:$0xff] %v1787_v28  ;;  %v1649_v0 = vmul.f32 %v3829_v21, %v3784_v13  ;;  %2261 = vrsqrt.f32 %v3837_v30  ;;  %v3856_v46 = vsel %vm1213_vm5, %v1214_v14, %v1212_v40  ;;  %vm1583_vm8 = vcmp.eq.f32.partialorder %v3681_v15, inf  ;;  %v3865_v14 = vpop.xlane.xlu0 %626 }
 0x1f5   : > { %v1615_v7 = vmul.f32 0.5, %v1614_v27  ;;  %v1410_v19 = vmul.f32 %v2258_v63, %v1409_v4  ;;  %v1737_v18 = vsub.f32 %v3606_v24, %v1551_v2  ;;  %v1733_v48 = vsub.f32 %v3592_v33, %v1503_v47  ;;  %v3874_v27 = vpop.xlane.xlu1 %623 }
 0x1f6   : > { %v1290_v43 = vmul.f32 %v3815_v38, %v1289_v56  ;;  %vm1585_vm9 = vcmp.eq.f32.partialorder %v3681_v15, 0.0  ;;  %v1794_v25 = vmax.f32 %v1762_v61, 0.0  ;;  %v1586_v49 = vand.u32 2147483648, %v3681_v15 }
 0x1f7   : > { %v1534_v23 = vmul.f32 %v1533_v31, %v3658_v62  ;;  %v1411_v1 = vmul.f32 0.5, %v1410_v19  ;;  %v1584_v34 = vsel %vm1583_vm8, %v3681_v15, %v1582_v20  ;;  %vm1535_vm10 = vcmp.eq.f32.partialorder %v3658_v62, inf  ;;  %v3876_v61 = vpop.xlane.xlu2 %893 }
 0x1f8   : > { %v1568_v32 = vsub.f32 1.5, %v1567_v5  ;;  %v1650_v24 = vmul.f32 %v3829_v21, %v1649_v0  ;;  %vm1537_vm11 = vcmp.eq.f32.partialorder %v3658_v62, 0.0  ;;  %v1538_v42 = vand.u32 2147483648, %v3658_v62 }
 0x1f9   : > { %v3870_v33 = vpop.eup %2259  ;;  %v1616_v50 = vsub.f32 1.5, %v1615_v7  ;;  %v1412_v40 = vsub.f32 1.5, %v1411_v1  ;;  %v3878_v56 = vadd.f32 1.0, %v1737_v18  ;;  %v3880_v28 = vadd.f32 1.0, %v1733_v48 }
 0x1fa   : > { %v2262_v2 = vpop.eup %2261  ;;  %v3882_v47 = vmul.f32 0.5, %v1290_v43  ;;  %vm1619_vm0 = vcmp.eq.f32.partialorder %v3735_v51, inf  ;;  %v1622_v31 = vand.u32 2147483648, %v3735_v51  ;;  %v1587_v4 = vsel %vm1585_vm9, %v1586_v49, %v1584_v34 }
 0x1fb   : > { %v1536_v20 = vsel %vm1535_vm10, %v3658_v62, %v1534_v23  ;;  %v3891_v5 = vld.sshfl [vmem:[#allocation1] sm:$0xff pattern:$0x73625140]  ;;  %v1413_v0 = vmul.f32 %v2258_v63, %v1412_v40  ;;  %v1445_v7 = vmul.f32 %v2262_v2, %v3837_v30  ;;  %v1569_v19 = vmul.f32 %v3786_v35, %v1568_v32 }
 0x1fc   : > { %1868 = vst [vmem:[#allocation1 + $0x3] ss:$4 sm:$0xff] %v1795_v60  ;;  %v1651_v18 = vmul.f32 0.5, %v1650_v24  ;;  %v1601_v48 = vmul.f32 %v3870_v33, %v3773_v58  ;;  %2263 = vrsqrt.f32 %v3827_v22  ;;  %v1617_v15 = vmul.f32 %v3793_v17, %v1616_v50  ;;  %v3917_v24 = vpop.xlane.xlu0 %947 }
 0x1fd   : > { %vm1571_vm1 = vcmp.eq.f32.partialorder %v3727_v29, inf  ;;  %1865 = vst [vmem:[#allocation1] ss:$4 sm:$0xff] %v1792_v3  ;;  %v1414_v63 = vmul.f32 %v1413_v0, %v3780_v26  ;;  %v1446_v43 = vmul.f32 %v2262_v2, %v1445_v7  ;;  %v1740_v49 = vsub.f32 %v3666_v52, %v1587_v4 }
 0x1fe   : > { %v1539_v35 = vsel %vm1537_vm11, %v1538_v42, %v1536_v20  ;;  %1867 = vst [vmem:[#allocation1 + $0x2] ss:$4 sm:$0xff] %v1794_v25  ;;  %vm1415_vm12 = vcmp.eq.f32.partialorder %v3780_v26, inf  ;;  %v1418_v60 = vand.u32 2147483648, %v3780_v26  ;;  %vm1417_vm13 = vcmp.eq.f32.partialorder %v3780_v26, 0.0 }
 0x1ff   : > { %v1416_v17 = vsel %vm1415_vm12, %v3780_v26, %v1414_v63  ;;  %v1447_v23 = vmul.f32 0.5, %v1446_v43  ;;  %2265 = vrsqrt.f32 %v3876_v61  ;;  %vm1621_vm14 = vcmp.eq.f32.partialorder %v3735_v51, 0.0  ;;  %v3919_v26 = vpop.xlane.xlu2 %902 }
 0x200   : > { %v1570_v11 = vmul.f32 %v1569_v19, %v3727_v29  ;;  %v1652_v52 = vsub.f32 1.5, %v1651_v18  ;;  %v1602_v62 = vmul.f32 %v3870_v33, %v1601_v48  ;;  %v1419_v3 = vsel %vm1417_vm13, %v1418_v60, %v1416_v17  ;;  %v3930_v19 = vpop.xlane.xlu1 %944 }
 0x201   : > { %v1801_v25 = vmax.f32 %v3878_v56, 0.0  ;;  %v1618_v1 = vmul.f32 %v1617_v15, %v3735_v51  ;;  %v1726_v34 = vsub.f32 %v3385_v9, %v1419_v3  ;;  %v1448_v32 = vsub.f32 1.5, %v1447_v23 }
 0x202   : > { %v3921_v42 = vpop.eup %2263  ;;  %v1797_v50 = vmax.f32 %v3880_v28, 0.0  ;;  %v1292_v40 = vsub.f32 1.5, %v3882_v47  ;;  %vm1573_vm15 = vcmp.eq.f32.partialorder %v3727_v29, 0.0  ;;  %v1574_v4 = vand.u32 2147483648, %v3727_v29 }
 0x203   : > { %v3927_v20 = vadd.f32 1.0, %v1740_v49  ;;  %v1736_v0 = vsub.f32 %v3259_v36, %v1539_v35  ;;  %v1758_v9 = vadd.f32 1.0, %v1726_v34  ;;  %v1449_v7 = vmul.f32 %v2262_v2, %v1448_v32 }
 0x204   : > { %v1572_v18 = vsel %vm1571_vm1, %v3727_v29, %v1570_v11  ;;  %v1653_v48 = vmul.f32 %v3829_v21, %v1652_v52  ;;  %v1603_v15 = vmul.f32 0.5, %v1602_v62  ;;  %2267 = vrsqrt.f32 %v3917_v24 }
 0x205   : > { %v2266_v63 = vpop.eup %2265  ;;  %v1620_v43 = vsel %vm1619_vm0, %v3735_v51, %v1618_v1  ;;  %v1790_v49 = vmax.f32 %v1758_v9, 0.0  ;;  %v1637_v36 = vmul.f32 %v3921_v42, %v3827_v22  ;;  %v1450_v2 = vmul.f32 %v1449_v7, %v3837_v30 }
 0x206   : > { %vm1451_vm2 = vcmp.eq.f32.partialorder %v3837_v30, inf  ;;  %v1454_v35 = vand.u32 2147483648, %v3837_v30  ;;  %v1481_v21 = vmul.f32 %v2266_v63, %v3876_v61  ;;  %2269 = vrsqrt.f32 %v3930_v19 }
 0x207   : > { %v1575_v60 = vsel %vm1573_vm15, %v1574_v4, %v1572_v18  ;;  %1860 = vst [vmem:[#allocation1 + $0x22] ss:$4 sm:$0xff] %v1790_v49  ;;  %v1452_v17 = vsel %vm1451_vm2, %v3837_v30, %v1450_v2  ;;  %vm1453_vm3 = vcmp.eq.f32.partialorder %v3837_v30, 0.0  ;;  %2271 = vrsqrt.f32 %v3874_v27  ;;  %v3957_v29 = vpop.xlane.xlu2 %911 }
 0x208   : > { %v1654_v23 = vmul.f32 %v1653_v48, %v3784_v13  ;;  %v1604_v11 = vsub.f32 1.5, %v1603_v15  ;;  %v1455_v52 = vsel %vm1453_vm3, %v1454_v35, %v1452_v17  ;;  %v1482_v62 = vmul.f32 %v2266_v63, %v1481_v21 }
 0x209   : > { %vm1655_vm4 = vcmp.eq.f32.partialorder %v3784_v13, inf  ;;  %v1638_v3 = vmul.f32 %v3921_v42, %v1637_v36  ;;  %v1729_v1 = vsub.f32 %v3690_v37, %v1455_v52  ;;  %2273 = vrsqrt.f32 %v3919_v26 }
 0x20a   : > { %v3959_v34 = vpop.eup %2267  ;;  %v3961_v30 = vadd.f32 1.0, %v1736_v0  ;;  %vm1657_vm5 = vcmp.eq.f32.partialorder %v3784_v13, 0.0  ;;  %v1658_v32 = vand.u32 2147483648, %v3784_v13  ;;  %v1483_v4 = vmul.f32 0.5, %v1482_v62 }
 0x20b   : > { %v1804_v9 = vmax.f32 %v3927_v20, 0.0  ;;  %v1623_v37 = vsel %vm1621_vm14, %v1622_v31, %v1620_v43  ;;  %v1739_v7 = vsub.f32 %v3307_v53, %v1575_v60  ;;  %v1761_v18 = vadd.f32 1.0, %v1729_v1 }
 0x20c   : > { %v3971_v48 = vpop.eup %2269  ;;  %v1656_v0 = vsel %vm1655_vm4, %v3784_v13, %v1654_v23  ;;  %v1605_v15 = vmul.f32 %v3870_v33, %v1604_v11  ;;  %v1484_v49 = vsub.f32 1.5, %v1483_v4  ;;  %v1639_v2 = vmul.f32 0.5, %v1638_v3 }
 0x20d   : > { %v3975_v36 = vpop.eup %2271  ;;  %v1793_v35 = vmax.f32 %v1761_v18, 0.0  ;;  %v1697_v21 = vmul.f32 %v3959_v34, %v3917_v24  ;;  %v2456_v17 = vmov 0   ;;  %2275 = vrsqrt.f32 %v3957_v29 }
 0x20e   : > { %2158 = vset.pattern.permute.xlu1 %v2456_v17  ;;  %2159 = vset.pattern.permute.xlu0 %v2456_v17  ;;  %v1800_v53 = vmax.f32 %v3961_v30, 0.0  ;;  %v1743_v51 = vsub.f32 %v3694_v45, %v1623_v37  ;;  %v1864_v31 = vld.sshfl [vmem:[#allocation1 + $0x20] sm:$0xff pattern:$0x73625140]  ;;  %2277 = vrsqrt.f32 %v3865_v14  ;;  %v1485_v33 = vmul.f32 %v2266_v63, %v1484_v49 }
 0x20f   : > { %1896 = vperm.xlu1 %2158, %v3891_v5   ;;  %2160 = vset.pattern.permute.xlu2 %v2456_v17  ;;  %v2274_v43 = vpop.eup %2273  ;;  %v3984_v60 = vadd.f32 1.0, %v1739_v7  ;;  %v1659_v23 = vsel %vm1657_vm5, %v1658_v32, %v1656_v0  ;;  %vm1607_vm6 = vcmp.eq.f32.partialorder %v3773_v58, inf  ;;  %1871 = vst [vmem:[#allocation1 + $0x22] ss:$4 sm:$0xff] %v1798_v8  ;;  %v1685_v45 = vmul.f32 %v3971_v48, %v3930_v19  ;;  %v4004_v62 = vpop.xlane.xlu2 %920 }
 0x210   : > { %1899 = vperm.xlu0 %2159, %v1864_v31   ;;  %v1606_v63 = vmul.f32 %v1605_v15, %v3773_v58  ;;  %vm1609_vm7 = vcmp.eq.f32.partialorder %v3773_v58, 0.0  ;;  %1870 = vst [vmem:[#allocation1 + $0x21] ss:$4 sm:$0xff] %v1797_v50  ;;  %v1313_v13 = vmul.f32 %v3975_v36, %v3874_v27  ;;  %v1486_v5 = vmul.f32 %v1485_v33, %v3876_v61 }
 0x211   : > { %v1517_v11 = vmul.f32 %v2274_v43, %v3919_v26  ;;  %v1640_v10 = vsub.f32 1.5, %v1639_v2  ;;  %1866 = vst [vmem:[#allocation1 + $0x1] ss:$4 sm:$0xff] %v1793_v35  ;;  %v1698_v8 = vmul.f32 %v3959_v34, %v1697_v21  ;;  %vm1487_vm8 = vcmp.eq.f32.partialorder %v3876_v61, inf }
 0x212   : > { %v1490_v52 = vand.u32 2147483648, %v3876_v61  ;;  %v1488_v28 = vsel %vm1487_vm8, %v3876_v61, %v1486_v5  ;;  %vm1489_vm9 = vcmp.eq.f32.partialorder %v3876_v61, 0.0  ;;  %2279 = vrsqrt.f32 %v4004_v62 }
 0x213   : > { %v1518_v50 = vmul.f32 %v2274_v43, %v1517_v11  ;;  %v2276_v3 = vpop.eup %2275  ;;  %v4009_v1 = vadd.f32 1.0, %v1743_v51  ;;  %v1610_v32 = vand.u32 2147483648, %v3773_v58  ;;  %v1686_v37 = vmul.f32 %v3971_v48, %v1685_v45 }
 0x214   : > { %v1491_v4 = vsel %vm1489_vm9, %v1490_v52, %v1488_v28  ;;  %v4013_v7 = vpop.eup %2277  ;;  %v1314_v18 = vmul.f32 %v3975_v36, %v1313_v13  ;;  %v1553_v61 = vmul.f32 %v2276_v3, %v3957_v29  ;;  %v1803_v49 = vmax.f32 %v3984_v60, 0.0 }
 0x215   : > { %v1732_v0 = vsub.f32 %v3703_v44, %v1491_v4  ;;  %v1519_v15 = vmul.f32 0.5, %v1518_v50  ;;  %v1746_v2 = vsub.f32 %v3182_v41, %v1659_v23  ;;  %v1608_v35 = vsel %vm1607_vm6, %v3773_v58, %v1606_v63 }
 0x216   : > { %v1641_v21 = vmul.f32 %v3921_v42, %v1640_v10  ;;  %v1699_v17 = vmul.f32 0.5, %v1698_v8  ;;  %v1554_v33 = vmul.f32 %v2276_v3, %v1553_v61  ;;  %v4026_v44 = vmul.f32 %v4013_v7, %v3865_v14 }
 0x217   : > { %v1764_v51 = vadd.f32 1.0, %v1732_v0  ;;  %v1520_v31 = vsub.f32 1.5, %v1519_v15  ;;  %vm1643_vm10 = vcmp.eq.f32.partialorder %v3827_v22, inf  ;;  %v1646_v60 = vand.u32 2147483648, %v3827_v22  ;;  %v4039_v28 = vpop.xlane.xlu2 %929 }
 0x218   : > { %v1687_v45 = vmul.f32 0.5, %v1686_v37  ;;  %v2280_v41 = vpop.eup %2279  ;;  %v1315_v23 = vmul.f32 0.5, %v1314_v18  ;;  %v1555_v63 = vmul.f32 0.5, %v1554_v33  ;;  %v1873_v11 = vld.sshfl [vmem:[#allocation1] sm:$0xff pattern:$0x73625140]  ;;  %v1611_v10 = vsel %vm1609_vm7, %v1610_v32, %v1608_v35 }
 0x219   : > { %v1796_v13 = vmax.f32 %v1764_v51, 0.0  ;;  %v1521_v5 = vmul.f32 %v2274_v43, %v1520_v31  ;;  %v4030_v42 = vadd.f32 1.0, %v1746_v2  ;;  %v1642_v8 = vmul.f32 %v1641_v21, %v3827_v22  ;;  %1902 = vperm.xlu2 %2160, %v1873_v11   ;;  %1875 = vst [vmem:[#allocation1] ss:$4 sm:$0xff] %v1800_v53 }
 0x21a   : > { %vm1645_vm11 = vcmp.eq.f32.partialorder %v3827_v22, 0.0  ;;  %v1589_v52 = vmul.f32 %v2280_v41, %v4004_v62  ;;  %v1700_v43 = vsub.f32 1.5, %v1699_v17  ;;  %v1556_v4 = vsub.f32 1.5, %v1555_v63  ;;  %1876 = vst [vmem:[#allocation1 + $0x1] ss:$4 sm:$0xff] %v1801_v25 }
 0x21b   : > { %1869 = vst [vmem:[#allocation1 + $0x20] ss:$4 sm:$0xff] %v1796_v13  ;;  %v1522_v50 = vmul.f32 %v1521_v5, %v3919_v26  ;;  %2281 = vrsqrt.f32 %v4039_v28  ;;  %v1688_v58 = vsub.f32 1.5, %v1687_v45  ;;  %vm1523_vm0 = vcmp.eq.f32.partialorder %v3919_v26, inf }
 0x21c   : > { %v1526_v32 = vand.u32 2147483648, %v3919_v26  ;;  %v1590_v37 = vmul.f32 %v2280_v41, %v1589_v52  ;;  %v1316_v30 = vsub.f32 1.5, %v1315_v23  ;;  %vm1525_vm1 = vcmp.eq.f32.partialorder %v3919_v26, 0.0  ;;  %1878 = vst [vmem:[#allocation1 + $0x3] ss:$4 sm:$0xff] %v1803_v49 }
 0x21d   : > { %v1524_v53 = vsel %vm1523_vm0, %v3919_v26, %v1522_v50  ;;  %v1557_v18 = vmul.f32 %v2276_v3, %v1556_v4  ;;  %v1742_v0 = vsub.f32 %v3344_v12, %v1611_v10  ;;  %v1706_v15 = vand.u32 2147483648, %v3917_v24 }
 0x21e   : > { %v1527_v61 = vsel %vm1525_vm1, %v1526_v32, %v1524_v53  ;;  %v1591_v2 = vmul.f32 0.5, %v1590_v37  ;;  %v1644_v35 = vsel %vm1643_vm10, %v3827_v22, %v1642_v8  ;;  %v1701_v56 = vmul.f32 %v3959_v34, %v1700_v43 }
 0x21f   : > { %vm1703_vm12 = vcmp.eq.f32.partialorder %v3917_v24, inf  ;;  %v1735_v25 = vsub.f32 %v3739_v6, %v1527_v61  ;;  %v1558_v26 = vmul.f32 %v1557_v18, %v3957_v29  ;;  %v1689_v3 = vmul.f32 %v3971_v48, %v1688_v58  ;;  %v4067_v33 = vpop.xlane.xlu2 %938 }
 0x220   : > { %vm1559_vm13 = vcmp.eq.f32.partialorder %v3957_v29, inf  ;;  %v1562_v12 = vand.u32 2147483648, %v3957_v29  ;;  %v1592_v49 = vsub.f32 1.5, %v1591_v2  ;;  %v1317_v17 = vmul.f32 %v3975_v36, %v1316_v30 }
 0x221   : > { %v2282_v21 = vpop.eup %2281  ;;  %v1767_v51 = vadd.f32 1.0, %v1735_v25  ;;  %v1560_v31 = vsel %vm1559_vm13, %v3957_v29, %v1558_v26  ;;  %vm1561_vm14 = vcmp.eq.f32.partialorder %v3957_v29, 0.0  ;;  %vm1705_vm15 = vcmp.eq.f32.partialorder %v3917_v24, 0.0 }
 0x222   : > { %vm1319_vm2 = vcmp.eq.f32.partialorder %v3874_v27, inf  ;;  %v1563_v6 = vsel %vm1561_vm14, %v1562_v12, %v1560_v31  ;;  %v1593_v34 = vmul.f32 %v2280_v41, %v1592_v49  ;;  %v1625_v48 = vmul.f32 %v2282_v21, %v4039_v28 }
 0x223   : > { %v1647_v45 = vsel %vm1645_vm11, %v1646_v60, %v1644_v35  ;;  %v1799_v23 = vmax.f32 %v1767_v51, 0.0  ;;  %v1738_v36 = vsub.f32 %v3141_v55, %v1563_v6  ;;  %2283 = vrsqrt.f32 %v4067_v33 }
 0x224   : > { %v1702_v29 = vmul.f32 %v1701_v56, %v3917_v24  ;;  %v1690_v13 = vmul.f32 %v1689_v3, %v3930_v19  ;;  %v1594_v5 = vmul.f32 %v1593_v34, %v4004_v62  ;;  %v1626_v63 = vmul.f32 %v2282_v21, %v1625_v48 }
 0x225   : > { %v1318_v41 = vmul.f32 %v1317_v17, %v3874_v27  ;;  %1872 = vst [vmem:[#allocation1 + $0x23] ss:$4 sm:$0xff] %v1799_v23  ;;  %v1770_v11 = vadd.f32 1.0, %v1738_v36  ;;  %vm1595_vm3 = vcmp.eq.f32.partialorder %v4004_v62, inf  ;;  %v1598_v22 = vand.u32 2147483648, %v4004_v62  ;;  %v4208_v36 = vld [vmem:[#allocation13_spill] sm:$0xff] }
 0x226   : > { %v1774_v60 = vadd.f32 1.0, %v1742_v0  ;;  %v1596_v55 = vsel %vm1595_vm3, %v4004_v62, %v1594_v5  ;;  %vm1597_vm4 = vcmp.eq.f32.partialorder %v4004_v62, 0.0  ;;  %v1627_v10 = vmul.f32 0.5, %v1626_v63 }
 0x227   : > { %v1745_v8 = vsub.f32 %v3439_v39, %v1647_v45  ;;  %vm1691_vm5 = vcmp.eq.f32.partialorder %v3930_v19, inf  ;;  %v1802_v52 = vmax.f32 %v1770_v11, 0.0  ;;  %v1599_v43 = vsel %vm1597_vm4, %v1598_v22, %v1596_v55 }
 0x228   : > { %v1704_v50 = vsel %vm1703_vm12, %v3917_v24, %v1702_v29  ;;  %v1692_v4 = vsel %vm1691_vm5, %v3930_v19, %v1690_v13  ;;  %v1741_v58 = vsub.f32 %v3856_v46, %v1599_v43  ;;  %v1628_v32 = vsub.f32 1.5, %v1627_v10  ;;  %v4096_v46 = vpop.xlane.xlu2 %941 }
 0x229   : > { %v2284_v37 = vpop.eup %2283  ;;  %v1320_v62 = vsel %vm1319_vm2, %v3874_v27, %v1318_v41  ;;  %vm1321_vm6 = vcmp.eq.f32.partialorder %v3874_v27, 0.0  ;;  %v1322_v39 = vand.u32 2147483648, %v3874_v27  ;;  %v1694_v30 = vand.u32 2147483648, %v3930_v19  ;;  %1877 = vst [vmem:[#allocation1 + $0x2] ss:$4 sm:$0xff] %v1802_v52 }
 0x22a   : > { %vm1693_vm7 = vcmp.eq.f32.partialorder %v3930_v19, 0.0  ;;  %v1773_v53 = vadd.f32 1.0, %v1741_v58  ;;  %v1629_v18 = vmul.f32 %v2282_v21, %v1628_v32  ;;  %v1661_v0 = vmul.f32 %v2284_v37, %v4067_v33 }
 0x22b   : > { %v1777_v61 = vadd.f32 1.0, %v1745_v8  ;;  %v1707_v2 = vsel %vm1705_vm15, %v1706_v15, %v1704_v50  ;;  %v1695_v35 = vsel %vm1693_vm7, %v1694_v30, %v1692_v4  ;;  %2285 = vrsqrt.f32 %v4096_v46 }
 0x22c   : > { %v1323_v56 = vsel %vm1321_vm6, %v1322_v39, %v1320_v62  ;;  %v1805_v27 = vmax.f32 %v1773_v53, 0.0  ;;  %v1630_v25 = vmul.f32 %v1629_v18, %v4039_v28  ;;  %v1662_v26 = vmul.f32 %v2284_v37, %v1661_v0  ;;  %v1874_v3 = vld.sshfl [vmem:[#allocation1 + $0x20] sm:$0xff pattern:$0x73625140] }
 0x22d   : > { %v1807_v19 = vmax.f32 %v4009_v1, 0.0  ;;  %v1806_v12 = vmax.f32 %v1774_v60, 0.0  ;;  %vm1631_vm8 = vcmp.eq.f32.partialorder %v4039_v28, inf  ;;  %v1634_v49 = vand.u32 2147483648, %v4039_v28  ;;  %1905 = vperm.xlu1 %2158, %v1874_v3   ;;  %1879 = vst [vmem:[#allocation1 + $0x20] ss:$4 sm:$0xff] %v1804_v9 }
 0x22e   : > { %v1749_v24 = vsub.f32 %v3653_v54, %v1695_v35  ;;  %v1632_v15 = vsel %vm1631_vm8, %v4039_v28, %v1630_v25  ;;  %vm1633_vm9 = vcmp.eq.f32.partialorder %v4039_v28, 0.0  ;;  %v1663_v21 = vmul.f32 0.5, %v1662_v26  ;;  %1880 = vst [vmem:[#allocation1 + $0x21] ss:$4 sm:$0xff] %v1805_v27 }
 0x22f   : > { %v1810_v17 = vmax.f32 %v4030_v42, 0.0  ;;  %v1809_v1 = vmax.f32 %v1777_v61, 0.0  ;;  %v1750_v51 = vsub.f32 %v1323_v56, %v1707_v2  ;;  %v1635_v31 = vsel %vm1633_vm9, %v1634_v49, %v1632_v15  ;;  %1881 = vst [vmem:[#allocation1 + $0x22] ss:$4 sm:$0xff] %v1806_v12 }
 0x230   : > { %v1326_v6 = vmul.f32 %v4013_v7, %v4026_v44  ;;  %v1744_v20 = vsub.f32 %v3326_v16, %v1635_v31  ;;  %v1664_v9 = vsub.f32 1.5, %v1663_v21  ;;  %1882 = vst [vmem:[#allocation1 + $0x23] ss:$4 sm:$0xff] %v1807_v19  ;;  %v1883_v54 = vld.sshfl [vmem:[#allocation1] sm:$0xff pattern:$0x73625140]  ;;  %v4116_v23 = vpop.xlane.xlu2 %950  ;;  %v1293_v16 = vmul.f32 %v3815_v38, %v1292_v40 }
 0x231   : > { %v2286_v34 = vpop.eup %2285  ;;  %vm1283_vm10 = vcmp.eq.f32.partialorder %v3024_v57, inf  ;;  %1908 = vperm.xlu2 %2160, %v1883_v54   ;;  %1886 = vst [vmem:[#allocation1 + $0x1] ss:$4 sm:$0xff] %v1809_v1  ;;  %v1781_v28 = vadd.f32 1.0, %v1749_v24  ;;  %v1782_v29 = vadd.f32 1.0, %v1750_v51  ;;  %2287 = vrsqrt.f32 %v4116_v23 }
 0x232   : > { %v1776_v48 = vadd.f32 1.0, %v1744_v20  ;;  %v1665_v42 = vmul.f32 %v2284_v37, %v1664_v9  ;;  %v1673_v45 = vmul.f32 %v2286_v34, %v4096_v46  ;;  %1887 = vst [vmem:[#allocation1 + $0x2] ss:$4 sm:$0xff] %v1810_v17  ;;  %v1284_v44 = vsel %vm1283_vm10, %v3024_v57, %v4208_v36 }
 0x233   : > { %v1327_v13 = vmul.f32 0.5, %v1326_v6  ;;  %vm1285_vm11 = vcmp.eq.f32.partialorder %v3024_v57, 0.0  ;;  %v1286_v11 = vand.u32 2147483648, %v3024_v57  ;;  %vm1667_vm0 = vcmp.eq.f32.partialorder %v4067_v33, inf }
 0x234   : > { %v1808_v5 = vmax.f32 %v1776_v48, 0.0  ;;  %v1666_v63 = vmul.f32 %v1665_v42, %v4067_v33  ;;  %v1674_v41 = vmul.f32 %v2286_v34, %v1673_v45  ;;  %v1670_v22 = vand.u32 2147483648, %v4067_v33 }
 0x235   : > { %v1813_v60 = vmax.f32 %v1781_v28, 0.0  ;;  %vm1669_vm1 = vcmp.eq.f32.partialorder %v4067_v33, 0.0  ;;  %v1287_v40 = vsel %vm1285_vm11, %v1286_v11, %v1284_v44  ;;  %v1294_v55 = vmul.f32 %v1293_v16, %v3560_v59 }
 0x236   : > { %v1668_v47 = vsel %vm1667_vm0, %v4067_v33, %v1666_v63  ;;  %v1675_v38 = vmul.f32 0.5, %v1674_v41  ;;  %1885 = vst [vmem:[#allocation1] ss:$4 sm:$0xff] %v1808_v5  ;;  %v1814_v10 = vmax.f32 %v1782_v29, 0.0  ;;  %v1328_v43 = vsub.f32 1.5, %v1327_v13 }
 0x237   : > { %v1671_v8 = vsel %vm1669_vm1, %v1670_v22, %v1668_v47  ;;  %v1884_v52 = vld.sshfl [vmem:[#allocation1 + $0x20] sm:$0xff pattern:$0x73625140]  ;;  %v2288_v4 = vpop.eup %2287  ;;  %vm1295_vm12 = vcmp.eq.f32.partialorder %v3560_v59, inf  ;;  %v1298_v18 = vand.u32 2147483648, %v3560_v59  ;;  %vm1679_vm13 = vcmp.eq.f32.partialorder %v4096_v46, inf }
 0x238   : > { %v1747_v50 = vsub.f32 %v1287_v40, %v1671_v8  ;;  %v1676_v57 = vsub.f32 1.5, %v1675_v38  ;;  %1911 = vperm.xlu1 %2158, %v1884_v52   ;;  %1890 = vst [vmem:[#allocation1 + $0x21] ss:$4 sm:$0xff] %v1813_v60  ;;  %v1709_v33 = vmul.f32 %v2288_v4, %v4116_v23  ;;  %v1296_v37 = vsel %vm1295_vm12, %v3560_v59, %v1294_v55 }
 0x239   : > { %1891 = vst [vmem:[#allocation1 + $0x22] ss:$4 sm:$0xff] %v1814_v10  ;;  %v1329_v62 = vmul.f32 %v4013_v7, %v1328_v43  ;;  %v1682_v0 = vand.u32 2147483648, %v4096_v46  ;;  %vm1297_vm14 = vcmp.eq.f32.partialorder %v3560_v59, 0.0  ;;  %vm1681_vm15 = vcmp.eq.f32.partialorder %v4096_v46, 0.0 }
 0x23a   : > { %v1779_v58 = vadd.f32 1.0, %v1747_v50  ;;  %v1677_v32 = vmul.f32 %v2286_v34, %v1676_v57  ;;  %v1710_v53 = vmul.f32 %v2288_v4, %v1709_v33  ;;  %v1299_v35 = vsel %vm1297_vm14, %v1298_v18, %v1296_v37 }
 0x23b   : > { %v1330_v56 = vmul.f32 %v1329_v62, %v3865_v14  ;;  %vm1331_vm2 = vcmp.eq.f32.partialorder %v3865_v14, inf  ;;  %v1334_v49 = vand.u32 2147483648, %v3865_v14  ;;  %vm1715_vm3 = vcmp.eq.f32.partialorder %v4116_v23, inf }
 0x23c   : > { %v1811_v39 = vmax.f32 %v1779_v58, 0.0  ;;  %v1678_v30 = vmul.f32 %v1677_v32, %v4096_v46  ;;  %v1711_v2 = vmul.f32 0.5, %v1710_v53  ;;  %vm1333_vm4 = vcmp.eq.f32.partialorder %v3865_v14, 0.0 }
 0x23d   : > { %v1332_v19 = vsel %vm1331_vm2, %v3865_v14, %v1330_v56  ;;  %vm1717_vm5 = vcmp.eq.f32.partialorder %v4116_v23, 0.0  ;;  %v1919_v9 = vlaneseq  ;;  %vm1924_vm6 = vcmask 130112  }
 0x23e   : > { %v1680_v61 = vsel %vm1679_vm13, %v4096_v46, %v1678_v30  ;;  %1888 = vst [vmem:[#allocation1 + $0x3] ss:$4 sm:$0xff] %v1811_v39  ;;  %v1712_v25 = vsub.f32 1.5, %v1711_v2  ;;  %v1718_v46 = vand.u32 2147483648, %v4116_v23  ;;  %v1335_v21 = vsel %vm1333_vm4, %v1334_v49, %v1332_v19 }
 0x23f   : > { %v1683_v7 = vsel %vm1681_vm15, %v1682_v0, %v1680_v61  ;;  %v1920_v54 = vand.u32 127, %v1919_v9  ;;  %vm1928_vm7 = vcmask 195712   ;;  %vm1932_vm8 = vcmask 261312  }
 0x240   : > { %v1748_v27 = vsub.f32 %v1299_v35, %v1683_v7  ;;  %v1713_v3 = vmul.f32 %v2288_v4, %v1712_v25  ;;  %vm1936_vm9 = vcmask 326912   ;;  %vm1940_vm10 = vcmask 392512  }
 0x241   : > { %v1922_v28 = vadd.s32 4294967288, %v1920_v54  ;;  %v1930_v45 = vadd.s32 4294967272, %v1920_v54  ;;  %v1938_v13 = vadd.s32 4294967256, %v1920_v54  ;;  %v1934_v63 = vadd.s32 4294967264, %v1920_v54 }
 0x242   : > { %v1780_v26 = vadd.f32 1.0, %v1748_v27  ;;  %v1714_v59 = vmul.f32 %v1713_v3, %v4116_v23  ;;  %v1942_v38 = vadd.s32 4294967248, %v1920_v54  ;;  %v1946_v55 = vadd.s32 4294967240, %v1920_v54 }
 0x243   : > { %vm1944_vm11 = vcmask 458112   ;;  %vm1948_vm0 = vcmask 523712   ;;  %vm1951_vm1 = vcmask 516096  }
 0x244   : > { %v1812_v12 = vmax.f32 %v1780_v26, 0.0  ;;  %v1716_v15 = vsel %vm1715_vm3, %v4116_v23, %v1714_v59  ;;  %v1926_v23 = vadd.s32 4294967280, %v1920_v54 }
 0x245   : > { %v1893_v24 = vld.sshfl [vmem:[#allocation1] sm:$0xff pattern:$0x73625140]  ;;  %v1719_v17 = vsel %vm1717_vm5, %v1718_v46, %v1716_v15 }
 0x246   : > { %1889 = vst [vmem:[#allocation1 + $0x20] ss:$4 sm:$0xff] %v1812_v12  ;;  %1914 = vperm.xlu2 %2160, %v1893_v24   ;;  %v1751_v1 = vsub.f32 %v1335_v21, %v1719_v17 }
 0x248   : > { %v1783_v51 = vadd.f32 1.0, %v1751_v1 }
 0x24a   : > { %v1815_v31 = vmax.f32 %v1783_v51, 0.0 }
 0x24c   : > { %1892 = vst [vmem:[#allocation1 + $0x23] ss:$4 sm:$0xff] %v1815_v31 }
 0x253   : > { %v1894_v6 = vld.sshfl [vmem:[#allocation1 + $0x20] sm:$0xff pattern:$0x73625140] }
 0x254   : > { %1917 = vperm.xlu1 %2158, %v1894_v6  }
 0x273   : > { %v1903_v34 = vpop.permute.xlu2 %1902 }
 0x274   : > { %v1927_v5 = vperm.slane %v1903_v34, %v1926_v23 }
 0x281   : > { %v1897_v20 = vpop.permute.xlu1 %1896 }
 0x282   : > { %v1900_v14 = vpop.permute.xlu0 %1899  ;;  %v1921_v36 = vperm.slane %v1897_v20, %v1920_v54 }
 0x283   : > { %v1923_v42 = vperm.slane %v1900_v14, %v1922_v28 }
 0x285   : > { %v1925_v16 = vsel %vm1924_vm6, %v1923_v42, %v1921_v36 }
 0x286   : > { %v1929_v11 = vsel %vm1928_vm7, %v1927_v5, %v1925_v16 }
 0x28b   : > { %v1909_v44 = vpop.permute.xlu2 %1908 }
 0x28c   : > { %v1935_v47 = vperm.slane %v1909_v44, %v1934_v63 }
 0x29f   : > { %v1906_v48 = vpop.permute.xlu1 %1905 }
 0x2a0   : > { %v1931_v29 = vperm.slane %v1906_v48, %v1930_v45  ;;  %v1915_v40 = vpop.permute.xlu2 %1914 }
 0x2a1   : > { %v1943_v52 = vperm.slane %v1915_v40, %v1942_v38 }
 0x2a2   : > { %v1933_v22 = vsel %vm1932_vm8, %v1931_v29, %v1929_v11 }
 0x2a3   : > { %v1937_v10 = vsel %vm1936_vm9, %v1935_v47, %v1933_v22 }
 0x2aa   : > { %v1912_v41 = vpop.permute.xlu1 %1911 }
 0x2ab   : > { %v1939_v60 = vperm.slane %v1912_v41, %v1938_v13 }
 0x2ad   : > { %v1941_v8 = vsel %vm1940_vm10, %v1939_v60, %v1937_v10 }
 0x2ae   : > { %v1945_v57 = vsel %vm1944_vm11, %v1943_v52, %v1941_v8 }
 0x2c6   : > { %v1918_v43 = vpop.permute.xlu1 %1917 }
 0x2c7   : > { %v1947_v50 = vperm.slane %v1918_v43, %v1946_v55 }
 0x2c9   : > { %v1949_v4 = vsel %vm1948_vm0, %v1947_v50, %v1945_v57 }
 0x2ca   : > { %1952 = vst.msk [vmem:[%s270_s6] sm:$0x1] %vm1951_vm1, %v1949_v4 }
 0x2cb   : > { %2406 = shalt.err (!%p2403_p2)
}
 0x2cc   : > { %2102 = dma.vmem_to_hbm [thread:$0]  (%p2522_p10), %s1965_s29, 16, %s1967_s1, %s1954_s16  }
 0x2cd PF: > { %p2119_p3 = scmp.ge.s32.totalorder %s2449_s15, 2  ;;  %s1978_s0 = sand.u32 1, %s2437_s12  }
 0x2ce   : > { %s1979_s26 = scalar_lea.sflag [#allocation4], %s1978_s0 }
 0x2cf   : > { %p2115_p4 = pnand %p2119_p3, %p2526_p11 }
 0x2d1   : > { %p2116_p13 = pneg %p2115_p4 }
 0x2d3   : > { %2432 = dma.done.wait (%p2116_p13), %s1979_s26, 16  }
 0x2d4   : > { %2434 = vsyncadd (%p2116_p13), %s1979_s26, 4294967280  ;;  %s4209_s27 = sld [smem:[#allocation12_spill]]  ;;  %p19_p5 = scmp.ge.s32.totalorder %s2502_s18, 6  }
 0x2d5   : > { %s4210_s12 = smov %s2441_s13  ;;  %s4211_s13 = smov %s2445_s14 }
 0x2d6   : > { %s4213_s15 = smov %s2502_s18  ;;  %21 = sbr.rel (!%p19_p5) target bundleno = 10 (0xa), region = 108 }
 0x2da   : > { %s4212_s14 = smov %s4209_s27 }
 0x2db   :  { %1984 = vsyncpa [#allocation3], 1 }
 0x2dc   :  { %1986 = vsyncpa [#allocation3 + $0x1], 1 }
 0x2dd   :  { %1987 = vsyncpa [#allocation6], 1 }
 0x2de   :  { %1989 = vsyncpa [#allocation6 + $0x1], 1 }
 0x2df   :  { %1990 = vsyncpa [#allocation4], 1 }
 0x2e0   :  { %1992 = vsyncpa [#allocation4 + $0x1], 1 }

</bundles_post_ra>
